<compile_context>
chip_gen: v6e
topology: v6e:2x2x1
jax: 0.10.0
libtpu: 0.0.40
codegen_flags: <defaults>
</compile_context>

<pallas_src>
import functools

import jax
import jax.numpy as jnp
from jax import lax
from jax.experimental import pallas as pl
from jax.experimental.pallas import tpu as pltpu

BN_EPS = 1e-5


# ----------------------------------------------------------------------------
# Banded conv weight: fold (kh, kw) taps + H/W zero padding into the MXU K dim
# ----------------------------------------------------------------------------
def _banded_conv_matrix(w_oidhw, H, W):
    """PyTorch Conv3d weight (P, Cin, 3, 3, 3) -> (3, H*W*Cin, H*W*P) bf16.

    M[kd, (h', w', c), (h, w, p)] = W[kd, h'-h+1, w'-w+1, c, p] when the tap is
    inside the 3x3 window, else 0.  Out-of-range (h', w') simply have no row,
    which implements 'same' zero padding in H and W exactly.
    """
    wt = jnp.transpose(w_oidhw, (2, 3, 4, 1, 0)).astype(jnp.float32)  # kd,kh,kw,C,P
    taps = jnp.arange(3)
    eh = (jnp.arange(H)[None, :, None] ==
          jnp.arange(H)[None, None, :] + taps[:, None, None] - 1).astype(jnp.float32)
    ew = (jnp.arange(W)[None, :, None] ==
          jnp.arange(W)[None, None, :] + taps[:, None, None] - 1).astype(jnp.float32)
    # (3, H, W, C, H, W, P): rows = (h', w', c), cols = (h, w, p)
    m = jnp.einsum("axh,bvw,kabcp->kxvchwp", eh, ew, wt)
    C, P = wt.shape[3], wt.shape[4]
    return m.reshape(3, H * W * C, H * W * P).astype(jnp.bfloat16)


# ----------------------------------------------------------------------------
# In-kernel helpers
# ----------------------------------------------------------------------------
def _lane_group_allreduce(v, group_size):
    """Sum over the `group_size` lanes of each channel group.

    v has lane layout (h, w, c) with c fastest; summing lanes congruent modulo
    C (= lanes // group_size) leaves, in EVERY lane, the sum over all (h, w)
    positions of that lane's channel.  log2(group_size) lane-rotate butterfly,
    exact f32, XLU only (group_size must be a power of two).
    """
    lanes = v.shape[-1]
    shift = lanes // group_size          # = number of channels
    while shift < lanes:
        v = v + pltpu.roll(v, shift=shift, axis=1)
        shift *= 2
    return v


# ----------------------------------------------------------------------------
# Fused residual-block kernel (single invocation, everything VMEM-resident)
# ----------------------------------------------------------------------------
def _residual_block_kernel(x_ref, m1_ref, m2_ref, g1_ref, b1_ref, g2_ref,
                           b2_ref, o_ref, xpad_ref, lhs_ref,
                           *, depth, hw, inv_count):
    nd, hwc = x_ref.shape            # nd = N*D rows, hwc = H*W*C lanes

    # Depth-boundary masks: rows are (n, d) with d = row % depth.  They zero
    # the depth-shifted column blocks at each batch element's first/last depth
    # slice ('same' zero padding along D, and no cross-batch leakage).
    d_idx = lax.broadcasted_iota(jnp.int32, (nd, hwc), 0) % depth
    not_first = d_idx != 0
    not_last = d_idx != (depth - 1)
    zeros_bf16 = jnp.zeros((nd, hwc), jnp.bfloat16)

    # Halo rows are already guarded by the masks; zero them once anyway.
    xpad_ref[0:1, :] = jnp.zeros((1, hwc), jnp.bfloat16)
    xpad_ref[nd + 1:nd + 2, :] = jnp.zeros((1, hwc), jnp.bfloat16)

    def conv(v_f32, m_ref):
        # One bf16 MXU matmul per conv: LHS column blocks are the three
        # depth-shifted copies of v (K = 3*H*W*C), RHS is the banded
        # (kh, kw)-folded weight.  f32 accumulation.
        vb = v_f32.astype(jnp.bfloat16)
        xpad_ref[1:nd + 1, :] = vb
        lhs_ref[:, 0:hwc] = jnp.where(not_first, xpad_ref[0:nd, :], zeros_bf16)
        lhs_ref[:, hwc:2 * hwc] = vb
        lhs_ref[:, 2 * hwc:3 * hwc] = jnp.where(not_last, xpad_ref[2:nd + 2, :],
                                                zeros_bf16)
        return jnp.dot(lhs_ref[...], m_ref[...],
                       preferred_element_type=jnp.float32)

    def bn_affine(acc, g_ref, b_ref):
        # Training-mode BatchNorm batch statistics, exact f32, two-pass
        # (centered) variance.  The (h, w) -> channel reduction is a lane
        # butterfly, so every (h, w, c) column directly holds its channel's
        # statistic (no broadcast-back step).
        colsum = jnp.sum(acc, axis=0, keepdims=True)                # (1, hwc)
        mean_c = _lane_group_allreduce(colsum, hw) * inv_count
        cent = acc - mean_c
        colsq = jnp.sum(cent * cent, axis=0, keepdims=True)
        var_c = _lane_group_allreduce(colsq, hw) * inv_count
        scale = g_ref[...] * lax.rsqrt(var_c + BN_EPS)
        bias = b_ref[...] - mean_c * scale
        return scale, bias

    x_f32 = x_ref[...]

    acc1 = conv(x_f32, m1_ref)                                 # conv1 (pre-BN)
    s1, t1 = bn_affine(acc1, g1_ref, b1_ref)
    y1 = jnp.maximum(acc1 * s1 + t1, 0.0)                      # BN1 + ReLU

    acc2 = conv(y1, m2_ref)                                    # conv2 (pre-BN)
    s2, t2 = bn_affine(acc2, g2_ref, b2_ref)
    o_ref[...] = jnp.maximum(acc2 * s2 + t2 + x_f32, 0.0)      # BN2 + add + ReLU


# ----------------------------------------------------------------------------
# ResidualBlock forward (wrapper glue)
# ----------------------------------------------------------------------------
def residual_block_forward(x_ncdhw, params):
    N, C, D, H, W = x_ncdhw.shape
    P = params["w1"].shape[0]
    assert P == C, "residual path requires planes == inplanes (downsample=None)"
    assert (H * W) & (H * W - 1) == 0, "in-kernel BN reduce needs H*W power of 2"
    hwc = H * W * C

    # NCDHW -> (N*D, H*W*C) channels-last rows.
    # TODO(synk): in a full network keep activations channels-last across
    # blocks so this transpose (and the inverse below) is paid once per net.
    x2d = jnp.transpose(x_ncdhw, (0, 2, 3, 4, 1)).astype(jnp.float32)
    x2d = x2d.reshape(N * D, hwc)

    # Banded weights, reshaped so the three kd taps stack along K (kd-major).
    m1 = _banded_conv_matrix(params["w1"], H, W).reshape(3 * hwc, hwc)
    m2 = _banded_conv_matrix(params["w2"], H, W).reshape(3 * hwc, hwc)

    def cols(v):  # per-channel vector -> lane-dense (h, w, c) column layout
        return jnp.tile(v.astype(jnp.float32), H * W).reshape(1, hwc)

    def full(shape):
        zeros = (0,) * len(shape)
        return pl.BlockSpec(shape, lambda i: zeros)

    kern = functools.partial(_residual_block_kernel, depth=D, hw=H * W,
                             inv_count=1.0 / float(N * D * H * W))

    out2d = pl.pallas_call(
        kern,
        out_shape=jax.ShapeDtypeStruct((N * D, hwc), jnp.float32),
        grid=(1,),   # whole block fits VMEM: one fused invocation
        in_specs=[full((N * D, hwc)), full((3 * hwc, hwc)), full((3 * hwc, hwc)),
                  full((1, hwc)), full((1, hwc)), full((1, hwc)), full((1, hwc))],
        out_specs=full((N * D, hwc)),
        scratch_shapes=[pltpu.VMEM((N * D + 2, hwc), jnp.bfloat16),   # depth halo
                        pltpu.VMEM((N * D, 3 * hwc), jnp.bfloat16)],  # matmul LHS
        compiler_params=pltpu.CompilerParams(
            dimension_semantics=("arbitrary",)),
    )(x2d, m1, m2, cols(params["gamma1"]), cols(params["beta1"]),
      cols(params["gamma2"]), cols(params["beta2"]))

    out = out2d.reshape(N, D, H, W, P)
    # TODO(synk): BatchNorm running_mean/running_var buffer updates (training
    # side effect) are not modeled; they do not affect the forward output.
    return jnp.transpose(out, (0, 4, 1, 2, 3))     # back to NCDHW


# ----------------------------------------------------------------------------
# Pure-JAX reference (for correctness check)
# ----------------------------------------------------------------------------
def reference_forward(x, params, conv_dtype=jnp.float32):
    def conv(v, w):
        return lax.conv_general_dilated(
            v.astype(conv_dtype), w.astype(conv_dtype),
            window_strides=(1, 1, 1), padding=((1, 1),) * 3,
            dimension_numbers=("NCDHW", "OIDHW", "NCDHW"),
            preferred_element_type=jnp.float32)

    def bn(v, gamma, beta):
        mean = jnp.mean(v, axis=(0, 2, 3, 4), keepdims=True)
        var = jnp.var(v, axis=(0, 2, 3, 4), keepdims=True)
        g = gamma.reshape(1, -1, 1, 1, 1)
        b = beta.reshape(1, -1, 1, 1, 1)
        return (v - mean) / jnp.sqrt(var + BN_EPS) * g + b

    out = jnp.maximum(bn(conv(x, params["w1"]), params["gamma1"], params["beta1"]), 0.0)
    out = bn(conv(out, params["w2"]), params["gamma2"], params["beta2"]) + x
    return jnp.maximum(out, 0.0)


if __name__ == "__main__":
    key = jax.random.PRNGKey(0)
    kx, k1, k2, kg1, kb1, kg2, kb2 = jax.random.split(key, 7)

    N, C, D, H, W = 2, 4, 8, 8, 8          # inplanes == planes (downsample=None)
    planes = C
    x = jax.random.normal(kx, (N, C, D, H, W), jnp.float32)

    params = {
        "w1": 0.1 * jax.random.normal(k1, (planes, C, 3, 3, 3), jnp.float32),
        "w2": 0.1 * jax.random.normal(k2, (planes, planes, 3, 3, 3), jnp.float32),
        "gamma1": 1.0 + 0.1 * jax.random.normal(kg1, (planes,), jnp.float32),
        "beta1": 0.1 * jax.random.normal(kb1, (planes,), jnp.float32),
        "gamma2": 1.0 + 0.1 * jax.random.normal(kg2, (planes,), jnp.float32),
        "beta2": 0.1 * jax.random.normal(kb2, (planes,), jnp.float32),
    }

    out = jax.jit(residual_block_forward)(x, params)
    out = jax.block_until_ready(out)
    assert out.shape == x.shape and out.dtype == jnp.float32

    # Tight check vs a reference that also uses bf16 conv operands (isolates
    # any structural error from the deliberate bf16 operand rounding).
    ref_bf16 = reference_forward(x, params, conv_dtype=jnp.bfloat16)
    err_bf16 = float(jnp.max(jnp.abs(out - ref_bf16)))
    assert err_bf16 < 5e-3, f"max abs error vs bf16 reference too large: {err_bf16}"

    # Loose check vs the full-f32 PyTorch-equivalent reference (bf16 MXU
    # operands with f32 accumulation cost a few 1e-3 at these magnitudes).
    ref_f32 = reference_forward(x, params, conv_dtype=jnp.float32)
    err_f32 = float(jnp.max(jnp.abs(out - ref_f32)))
    assert err_f32 < 5e-2, f"max abs error vs f32 reference too large: {err_f32}"

    print("KERNEL_OK")
</pallas_src>

<mosaic_0001>
module attributes {stable_mosaic.version = 11 : i64} {
  func.func @_residual_block_kernel(%arg0: i32, %arg1: memref<16x256xf32, #tpu.memory_space<vmem>>, %arg2: memref<768x256xbf16, #tpu.memory_space<vmem>>, %arg3: memref<768x256xbf16, #tpu.memory_space<vmem>>, %arg4: memref<1x256xf32, #tpu.memory_space<vmem>>, %arg5: memref<1x256xf32, #tpu.memory_space<vmem>>, %arg6: memref<1x256xf32, #tpu.memory_space<vmem>>, %arg7: memref<1x256xf32, #tpu.memory_space<vmem>>, %arg8: memref<16x256xf32, #tpu.memory_space<vmem>>, %arg9: memref<18x256xbf16, #tpu.memory_space<vmem>>, %arg10: memref<16x768xbf16, #tpu.memory_space<vmem>>) attributes {dimension_semantics = [#tpu.dimension_semantics<arbitrary>], iteration_bounds = array<i64: 1>, scalar_prefetch = 0 : i64, scratch_operands = 2 : i64, tpu.core_type = #tpu.core_type<tc>, window_params = [{pipeline_mode = #tpu.pipeline_mode<synchronous>, transform_indices = @transform_0, window_bounds = array<i64: 16, 256>}, {pipeline_mode = #tpu.pipeline_mode<synchronous>, transform_indices = @transform_1, window_bounds = array<i64: 768, 256>}, {pipeline_mode = #tpu.pipeline_mode<synchronous>, transform_indices = @transform_2, window_bounds = array<i64: 768, 256>}, {pipeline_mode = #tpu.pipeline_mode<synchronous>, transform_indices = @transform_3, window_bounds = array<i64: 1, 256>}, {pipeline_mode = #tpu.pipeline_mode<synchronous>, transform_indices = @transform_4, window_bounds = array<i64: 1, 256>}, {pipeline_mode = #tpu.pipeline_mode<synchronous>, transform_indices = @transform_5, window_bounds = array<i64: 1, 256>}, {pipeline_mode = #tpu.pipeline_mode<synchronous>, transform_indices = @transform_6, window_bounds = array<i64: 1, 256>}, {pipeline_mode = #tpu.pipeline_mode<synchronous>, transform_indices = @transform_7, window_bounds = array<i64: 16, 256>}]} {
    %0 = tpu.iota {dimensions = array<i32: 0>} : vector<16x256xi32>
    %c8_i32 = arith.constant 8 : i32
    %c0_i32 = arith.constant 0 : i32
    %1 = arith.cmpi eq, %c8_i32, %c0_i32 : i32
    %c1_i32 = arith.constant 1 : i32
    %2 = arith.select %1, %c1_i32, %c8_i32 : i32
    %3 = vector.broadcast %2 : i32 to vector<16x256xi32>
    %4 = arith.remsi %0, %3 : vector<16x256xi32>
    %c0_i32_0 = arith.constant 0 : i32
    %5 = vector.broadcast %c0_i32_0 : i32 to vector<16x256xi32>
    %6 = arith.cmpi ne, %4, %5 : vector<16x256xi32>
    %c0_i32_1 = arith.constant 0 : i32
    %7 = vector.broadcast %c0_i32_1 : i32 to vector<16x256xi32>
    %8 = arith.cmpi slt, %4, %7 : vector<16x256xi32>
    %c0_i32_2 = arith.constant 0 : i32
    %9 = arith.cmpi slt, %2, %c0_i32_2 : i32
    %10 = vector.broadcast %9 : i1 to vector<16x256xi1>
    %11 = vector.broadcast %10 : vector<16x256xi1> to vector<16x256xi1>
    %12 = arith.xori %8, %11 : vector<16x256xi1>
    %13 = arith.andi %12, %6 : vector<16x256xi1>
    %14 = vector.broadcast %2 : i32 to vector<16x256xi32>
    %15 = arith.addi %4, %14 : vector<16x256xi32>
    %16 = arith.select %13, %15, %4 : vector<16x256xi1>, vector<16x256xi32>
    %c0_i32_3 = arith.constant 0 : i32
    %17 = vector.broadcast %c0_i32_3 : i32 to vector<16x256xi32>
    %18 = arith.cmpi ne, %16, %17 : vector<16x256xi32>
    %c7_i32 = arith.constant 7 : i32
    %19 = vector.broadcast %c7_i32 : i32 to vector<16x256xi32>
    %20 = arith.cmpi ne, %16, %19 : vector<16x256xi32>
    %cst = arith.constant 0.000000e+00 : bf16
    %21 = vector.broadcast %cst : bf16 to vector<16x256xbf16>
    %cst_4 = arith.constant 0.000000e+00 : bf16
    %22 = vector.broadcast %cst_4 : bf16 to vector<1x256xbf16>
    %c0 = arith.constant 0 : index
    %c0_5 = arith.constant 0 : index
    %23 = vector.load %arg9[%c0, %c0_5] : memref<18x256xbf16, #tpu.memory_space<vmem>>, vector<1x256xbf16>
    tpu.vector_store %arg9[%c0, %c0_5], %22 {strides = array<i32>} : memref<18x256xbf16, #tpu.memory_space<vmem>>, vector<1x256xbf16>,
    %cst_6 = arith.constant 0.000000e+00 : bf16
    %24 = vector.broadcast %cst_6 : bf16 to vector<1x256xbf16>
    %c17 = arith.constant 17 : index
    %c0_7 = arith.constant 0 : index
    %25 = vector.load %arg9[%c17, %c0_7] : memref<18x256xbf16, #tpu.memory_space<vmem>>, vector<1x256xbf16>
    tpu.vector_store %arg9[%c17, %c0_7], %24 {strides = array<i32>} : memref<18x256xbf16, #tpu.memory_space<vmem>>, vector<1x256xbf16>,
    %c0_8 = arith.constant 0 : index
    %c0_9 = arith.constant 0 : index
    %26 = vector.load %arg1[%c0_8, %c0_9] : memref<16x256xf32, #tpu.memory_space<vmem>>, vector<16x256xf32>
    %27 = arith.truncf %26 : vector<16x256xf32> to vector<16x256xbf16>
    %c1 = arith.constant 1 : index
    %c0_10 = arith.constant 0 : index
    %28 = vector.load %arg9[%c1, %c0_10] : memref<18x256xbf16, #tpu.memory_space<vmem>>, vector<16x256xbf16>
    tpu.vector_store %arg9[%c1, %c0_10], %27 {strides = array<i32>} : memref<18x256xbf16, #tpu.memory_space<vmem>>, vector<16x256xbf16>,
    %c0_11 = arith.constant 0 : index
    %c0_12 = arith.constant 0 : index
    %29 = vector.load %arg9[%c0_11, %c0_12] : memref<18x256xbf16, #tpu.memory_space<vmem>>, vector<16x256xbf16>
    %30 = arith.select %18, %29, %21 : vector<16x256xi1>, vector<16x256xbf16>
    %c0_13 = arith.constant 0 : index
    %c0_14 = arith.constant 0 : index
    %31 = vector.load %arg10[%c0_13, %c0_14] : memref<16x768xbf16, #tpu.memory_space<vmem>>, vector<16x256xbf16>
    tpu.vector_store %arg10[%c0_13, %c0_14], %30 {strides = array<i32>} : memref<16x768xbf16, #tpu.memory_space<vmem>>, vector<16x256xbf16>,
    %c0_15 = arith.constant 0 : index
    %c256 = arith.constant 256 : index
    %32 = vector.load %arg10[%c0_15, %c256] : memref<16x768xbf16, #tpu.memory_space<vmem>>, vector<16x256xbf16>
    tpu.vector_store %arg10[%c0_15, %c256], %27 {strides = array<i32>} : memref<16x768xbf16, #tpu.memory_space<vmem>>, vector<16x256xbf16>,
    %c2 = arith.constant 2 : index
    %c0_16 = arith.constant 0 : index
    %33 = vector.load %arg9[%c2, %c0_16] : memref<18x256xbf16, #tpu.memory_space<vmem>>, vector<16x256xbf16>
    %34 = arith.select %20, %33, %21 : vector<16x256xi1>, vector<16x256xbf16>
    %c0_17 = arith.constant 0 : index
    %c512 = arith.constant 512 : index
    %35 = vector.load %arg10[%c0_17, %c512] : memref<16x768xbf16, #tpu.memory_space<vmem>>, vector<16x256xbf16>
    tpu.vector_store %arg10[%c0_17, %c512], %34 {strides = array<i32>} : memref<16x768xbf16, #tpu.memory_space<vmem>>, vector<16x256xbf16>,
    %c0_18 = arith.constant 0 : index
    %c0_19 = arith.constant 0 : index
    %36 = vector.load %arg10[%c0_18, %c0_19] : memref<16x768xbf16, #tpu.memory_space<vmem>>, vector<16x768xbf16>
    %c0_20 = arith.constant 0 : index
    %c0_21 = arith.constant 0 : index
    %37 = vector.load %arg2[%c0_20, %c0_21] : memref<768x256xbf16, #tpu.memory_space<vmem>>, vector<768x256xbf16>
    %cst_22 = arith.constant dense<0.000000e+00> : vector<16x256xf32>
    %38 = tpu.matmul %36, %37, %cst_22 {dimension_numbers = #tpu.dot_dimension_numbers<[1], [0], [0], [1], [0, 0, 1, 1], [], []>} : vector<16x768xbf16>, vector<768x256xbf16>, vector<16x256xf32> -> vector<16x256xf32>
    %cst_23 = arith.constant dense<0.000000e+00> : vector<256xf32>
    %39 = vector.multi_reduction <add>, %38, %cst_23 [0] : vector<16x256xf32> to vector<256xf32>
    %40 = vector.shape_cast %39 : vector<256xf32> to vector<1x256xf32>
    %c4_i32 = arith.constant 4 : i32
    %41 = tpu.dynamic_rotate %40 by %c4_i32 dim 1 : vector<1x256xf32>, i32 -> vector<1x256xf32>
    %42 = arith.addf %40, %41 : vector<1x256xf32>
    %c8_i32_24 = arith.constant 8 : i32
    %43 = tpu.dynamic_rotate %42 by %c8_i32_24 dim 1 : vector<1x256xf32>, i32 -> vector<1x256xf32>
    %44 = arith.addf %42, %43 : vector<1x256xf32>
    %c16_i32 = arith.constant 16 : i32
    %45 = tpu.dynamic_rotate %44 by %c16_i32 dim 1 : vector<1x256xf32>, i32 -> vector<1x256xf32>
    %46 = arith.addf %44, %45 : vector<1x256xf32>
    %c32_i32 = arith.constant 32 : i32
    %47 = tpu.dynamic_rotate %46 by %c32_i32 dim 1 : vector<1x256xf32>, i32 -> vector<1x256xf32>
    %48 = arith.addf %46, %47 : vector<1x256xf32>
    %c64_i32 = arith.constant 64 : i32
    %49 = tpu.dynamic_rotate %48 by %c64_i32 dim 1 : vector<1x256xf32>, i32 -> vector<1x256xf32>
    %50 = arith.addf %48, %49 : vector<1x256xf32>
    %c128_i32 = arith.constant 128 : i32
    %51 = tpu.dynamic_rotate %50 by %c128_i32 dim 1 : vector<1x256xf32>, i32 -> vector<1x256xf32>
    %52 = arith.addf %50, %51 : vector<1x256xf32>
    %cst_25 = arith.constant 9.765625E-4 : f32
    %53 = vector.broadcast %cst_25 : f32 to vector<1x256xf32>
    %54 = arith.mulf %52, %53 : vector<1x256xf32>
    %55 = vector.broadcast %54 : vector<1x256xf32> to vector<16x256xf32>
    %56 = arith.subf %38, %55 : vector<16x256xf32>
    %57 = arith.mulf %56, %56 : vector<16x256xf32>
    %cst_26 = arith.constant dense<0.000000e+00> : vector<256xf32>
    %58 = vector.multi_reduction <add>, %57, %cst_26 [0] : vector<16x256xf32> to vector<256xf32>
    %59 = vector.shape_cast %58 : vector<256xf32> to vector<1x256xf32>
    %c4_i32_27 = arith.constant 4 : i32
    %60 = tpu.dynamic_rotate %59 by %c4_i32_27 dim 1 : vector<1x256xf32>, i32 -> vector<1x256xf32>
    %61 = arith.addf %59, %60 : vector<1x256xf32>
    %c8_i32_28 = arith.constant 8 : i32
    %62 = tpu.dynamic_rotate %61 by %c8_i32_28 dim 1 : vector<1x256xf32>, i32 -> vector<1x256xf32>
    %63 = arith.addf %61, %62 : vector<1x256xf32>
    %c16_i32_29 = arith.constant 16 : i32
    %64 = tpu.dynamic_rotate %63 by %c16_i32_29 dim 1 : vector<1x256xf32>, i32 -> vector<1x256xf32>
    %65 = arith.addf %63, %64 : vector<1x256xf32>
    %c32_i32_30 = arith.constant 32 : i32
    %66 = tpu.dynamic_rotate %65 by %c32_i32_30 dim 1 : vector<1x256xf32>, i32 -> vector<1x256xf32>
    %67 = arith.addf %65, %66 : vector<1x256xf32>
    %c64_i32_31 = arith.constant 64 : i32
    %68 = tpu.dynamic_rotate %67 by %c64_i32_31 dim 1 : vector<1x256xf32>, i32 -> vector<1x256xf32>
    %69 = arith.addf %67, %68 : vector<1x256xf32>
    %c128_i32_32 = arith.constant 128 : i32
    %70 = tpu.dynamic_rotate %69 by %c128_i32_32 dim 1 : vector<1x256xf32>, i32 -> vector<1x256xf32>
    %71 = arith.addf %69, %70 : vector<1x256xf32>
    %cst_33 = arith.constant 9.765625E-4 : f32
    %72 = vector.broadcast %cst_33 : f32 to vector<1x256xf32>
    %73 = arith.mulf %71, %72 : vector<1x256xf32>
    %c0_34 = arith.constant 0 : index
    %c0_35 = arith.constant 0 : index
    %74 = vector.load %arg4[%c0_34, %c0_35] : memref<1x256xf32, #tpu.memory_space<vmem>>, vector<1x256xf32>
    %cst_36 = arith.constant 9.99999974E-6 : f32
    %75 = vector.broadcast %cst_36 : f32 to vector<1x256xf32>
    %76 = arith.addf %73, %75 : vector<1x256xf32>
    %77 = math.rsqrt %76 : vector<1x256xf32>
    %78 = arith.mulf %74, %77 : vector<1x256xf32>
    %c0_37 = arith.constant 0 : index
    %c0_38 = arith.constant 0 : index
    %79 = vector.load %arg5[%c0_37, %c0_38] : memref<1x256xf32, #tpu.memory_space<vmem>>, vector<1x256xf32>
    %80 = arith.mulf %54, %78 : vector<1x256xf32>
    %81 = arith.subf %79, %80 : vector<1x256xf32>
    %82 = vector.broadcast %78 : vector<1x256xf32> to vector<16x256xf32>
    %83 = arith.mulf %38, %82 : vector<16x256xf32>
    %84 = vector.broadcast %81 : vector<1x256xf32> to vector<16x256xf32>
    %85 = arith.addf %83, %84 : vector<16x256xf32>
    %cst_39 = arith.constant 0.000000e+00 : f32
    %86 = vector.broadcast %cst_39 : f32 to vector<16x256xf32>
    %87 = arith.maximumf %85, %86 : vector<16x256xf32>
    %88 = arith.truncf %87 : vector<16x256xf32> to vector<16x256xbf16>
    %c1_40 = arith.constant 1 : index
    %c0_41 = arith.constant 0 : index
    %89 = vector.load %arg9[%c1_40, %c0_41] : memref<18x256xbf16, #tpu.memory_space<vmem>>, vector<16x256xbf16>
    tpu.vector_store %arg9[%c1_40, %c0_41], %88 {strides = array<i32>} : memref<18x256xbf16, #tpu.memory_space<vmem>>, vector<16x256xbf16>,
    %c0_42 = arith.constant 0 : index
    %c0_43 = arith.constant 0 : index
    %90 = vector.load %arg9[%c0_42, %c0_43] : memref<18x256xbf16, #tpu.memory_space<vmem>>, vector<16x256xbf16>
    %91 = arith.select %18, %90, %21 : vector<16x256xi1>, vector<16x256xbf16>
    %c0_44 = arith.constant 0 : index
    %c0_45 = arith.constant 0 : index
    %92 = vector.load %arg10[%c0_44, %c0_45] : memref<16x768xbf16, #tpu.memory_space<vmem>>, vector<16x256xbf16>
    tpu.vector_store %arg10[%c0_44, %c0_45], %91 {strides = array<i32>} : memref<16x768xbf16, #tpu.memory_space<vmem>>, vector<16x256xbf16>,
    %c0_46 = arith.constant 0 : index
    %c256_47 = arith.constant 256 : index
    %93 = vector.load %arg10[%c0_46, %c256_47] : memref<16x768xbf16, #tpu.memory_space<vmem>>, vector<16x256xbf16>
    tpu.vector_store %arg10[%c0_46, %c256_47], %88 {strides = array<i32>} : memref<16x768xbf16, #tpu.memory_space<vmem>>, vector<16x256xbf16>,
    %c2_48 = arith.constant 2 : index
    %c0_49 = arith.constant 0 : index
    %94 = vector.load %arg9[%c2_48, %c0_49] : memref<18x256xbf16, #tpu.memory_space<vmem>>, vector<16x256xbf16>
    %95 = arith.select %20, %94, %21 : vector<16x256xi1>, vector<16x256xbf16>
    %c0_50 = arith.constant 0 : index
    %c512_51 = arith.constant 512 : index
    %96 = vector.load %arg10[%c0_50, %c512_51] : memref<16x768xbf16, #tpu.memory_space<vmem>>, vector<16x256xbf16>
    tpu.vector_store %arg10[%c0_50, %c512_51], %95 {strides = array<i32>} : memref<16x768xbf16, #tpu.memory_space<vmem>>, vector<16x256xbf16>,
    %c0_52 = arith.constant 0 : index
    %c0_53 = arith.constant 0 : index
    %97 = vector.load %arg10[%c0_52, %c0_53] : memref<16x768xbf16, #tpu.memory_space<vmem>>, vector<16x768xbf16>
    %c0_54 = arith.constant 0 : index
    %c0_55 = arith.constant 0 : index
    %98 = vector.load %arg3[%c0_54, %c0_55] : memref<768x256xbf16, #tpu.memory_space<vmem>>, vector<768x256xbf16>
    %cst_56 = arith.constant dense<0.000000e+00> : vector<16x256xf32>
    %99 = tpu.matmul %97, %98, %cst_56 {dimension_numbers = #tpu.dot_dimension_numbers<[1], [0], [0], [1], [0, 0, 1, 1], [], []>} : vector<16x768xbf16>, vector<768x256xbf16>, vector<16x256xf32> -> vector<16x256xf32>
    %cst_57 = arith.constant dense<0.000000e+00> : vector<256xf32>
    %100 = vector.multi_reduction <add>, %99, %cst_57 [0] : vector<16x256xf32> to vector<256xf32>
    %101 = vector.shape_cast %100 : vector<256xf32> to vector<1x256xf32>
    %c4_i32_58 = arith.constant 4 : i32
    %102 = tpu.dynamic_rotate %101 by %c4_i32_58 dim 1 : vector<1x256xf32>, i32 -> vector<1x256xf32>
    %103 = arith.addf %101, %102 : vector<1x256xf32>
    %c8_i32_59 = arith.constant 8 : i32
    %104 = tpu.dynamic_rotate %103 by %c8_i32_59 dim 1 : vector<1x256xf32>, i32 -> vector<1x256xf32>
    %105 = arith.addf %103, %104 : vector<1x256xf32>
    %c16_i32_60 = arith.constant 16 : i32
    %106 = tpu.dynamic_rotate %105 by %c16_i32_60 dim 1 : vector<1x256xf32>, i32 -> vector<1x256xf32>
    %107 = arith.addf %105, %106 : vector<1x256xf32>
    %c32_i32_61 = arith.constant 32 : i32
    %108 = tpu.dynamic_rotate %107 by %c32_i32_61 dim 1 : vector<1x256xf32>, i32 -> vector<1x256xf32>
    %109 = arith.addf %107, %108 : vector<1x256xf32>
    %c64_i32_62 = arith.constant 64 : i32
    %110 = tpu.dynamic_rotate %109 by %c64_i32_62 dim 1 : vector<1x256xf32>, i32 -> vector<1x256xf32>
    %111 = arith.addf %109, %110 : vector<1x256xf32>
    %c128_i32_63 = arith.constant 128 : i32
    %112 = tpu.dynamic_rotate %111 by %c128_i32_63 dim 1 : vector<1x256xf32>, i32 -> vector<1x256xf32>
    %113 = arith.addf %111, %112 : vector<1x256xf32>
    %cst_64 = arith.constant 9.765625E-4 : f32
    %114 = vector.broadcast %cst_64 : f32 to vector<1x256xf32>
    %115 = arith.mulf %113, %114 : vector<1x256xf32>
    %116 = vector.broadcast %115 : vector<1x256xf32> to vector<16x256xf32>
    %117 = arith.subf %99, %116 : vector<16x256xf32>
    %118 = arith.mulf %117, %117 : vector<16x256xf32>
    %cst_65 = arith.constant dense<0.000000e+00> : vector<256xf32>
    %119 = vector.multi_reduction <add>, %118, %cst_65 [0] : vector<16x256xf32> to vector<256xf32>
    %120 = vector.shape_cast %119 : vector<256xf32> to vector<1x256xf32>
    %c4_i32_66 = arith.constant 4 : i32
    %121 = tpu.dynamic_rotate %120 by %c4_i32_66 dim 1 : vector<1x256xf32>, i32 -> vector<1x256xf32>
    %122 = arith.addf %120, %121 : vector<1x256xf32>
    %c8_i32_67 = arith.constant 8 : i32
    %123 = tpu.dynamic_rotate %122 by %c8_i32_67 dim 1 : vector<1x256xf32>, i32 -> vector<1x256xf32>
    %124 = arith.addf %122, %123 : vector<1x256xf32>
    %c16_i32_68 = arith.constant 16 : i32
    %125 = tpu.dynamic_rotate %124 by %c16_i32_68 dim 1 : vector<1x256xf32>, i32 -> vector<1x256xf32>
    %126 = arith.addf %124, %125 : vector<1x256xf32>
    %c32_i32_69 = arith.constant 32 : i32
    %127 = tpu.dynamic_rotate %126 by %c32_i32_69 dim 1 : vector<1x256xf32>, i32 -> vector<1x256xf32>
    %128 = arith.addf %126, %127 : vector<1x256xf32>
    %c64_i32_70 = arith.constant 64 : i32
    %129 = tpu.dynamic_rotate %128 by %c64_i32_70 dim 1 : vector<1x256xf32>, i32 -> vector<1x256xf32>
    %130 = arith.addf %128, %129 : vector<1x256xf32>
    %c128_i32_71 = arith.constant 128 : i32
    %131 = tpu.dynamic_rotate %130 by %c128_i32_71 dim 1 : vector<1x256xf32>, i32 -> vector<1x256xf32>
    %132 = arith.addf %130, %131 : vector<1x256xf32>
    %cst_72 = arith.constant 9.765625E-4 : f32
    %133 = vector.broadcast %cst_72 : f32 to vector<1x256xf32>
    %134 = arith.mulf %132, %133 : vector<1x256xf32>
    %c0_73 = arith.constant 0 : index
    %c0_74 = arith.constant 0 : index
    %135 = vector.load %arg6[%c0_73, %c0_74] : memref<1x256xf32, #tpu.memory_space<vmem>>, vector<1x256xf32>
    %cst_75 = arith.constant 9.99999974E-6 : f32
    %136 = vector.broadcast %cst_75 : f32 to vector<1x256xf32>
    %137 = arith.addf %134, %136 : vector<1x256xf32>
    %138 = math.rsqrt %137 : vector<1x256xf32>
    %139 = arith.mulf %135, %138 : vector<1x256xf32>
    %c0_76 = arith.constant 0 : index
    %c0_77 = arith.constant 0 : index
    %140 = vector.load %arg7[%c0_76, %c0_77] : memref<1x256xf32, #tpu.memory_space<vmem>>, vector<1x256xf32>
    %141 = arith.mulf %115, %139 : vector<1x256xf32>
    %142 = arith.subf %140, %141 : vector<1x256xf32>
    %143 = vector.broadcast %139 : vector<1x256xf32> to vector<16x256xf32>
    %144 = arith.mulf %99, %143 : vector<16x256xf32>
    %145 = vector.broadcast %142 : vector<1x256xf32> to vector<16x256xf32>
    %146 = arith.addf %144, %145 : vector<16x256xf32>
    %147 = arith.addf %146, %26 : vector<16x256xf32>
    %cst_78 = arith.constant 0.000000e+00 : f32
    %148 = vector.broadcast %cst_78 : f32 to vector<16x256xf32>
    %149 = arith.maximumf %147, %148 : vector<16x256xf32>
    %c0_79 = arith.constant 0 : index
    %c0_80 = arith.constant 0 : index
    %150 = vector.load %arg8[%c0_79, %c0_80] : memref<16x256xf32, #tpu.memory_space<vmem>>, vector<16x256xf32>
    tpu.vector_store %arg8[%c0_79, %c0_80], %149 {strides = array<i32>} : memref<16x256xf32, #tpu.memory_space<vmem>>, vector<16x256xf32>,
    return
  }
  func.func @transform_0(%arg0: i32) -> (i32, i32) {
    %c0_i32 = arith.constant 0 : i32
    %c0_i32_0 = arith.constant 0 : i32
    %c0_i32_1 = arith.constant 0 : i32
    return %c0_i32, %c0_i32_0 : i32, i32
  }
  func.func @transform_1(%arg0: i32) -> (i32, i32) {
    %c0_i32 = arith.constant 0 : i32
    %c0_i32_0 = arith.constant 0 : i32
    %c0_i32_1 = arith.constant 0 : i32
    return %c0_i32, %c0_i32_0 : i32, i32
  }
  func.func @transform_2(%arg0: i32) -> (i32, i32) {
    %c0_i32 = arith.constant 0 : i32
    %c0_i32_0 = arith.constant 0 : i32
    %c0_i32_1 = arith.constant 0 : i32
    return %c0_i32, %c0_i32_0 : i32, i32
  }
  func.func @transform_3(%arg0: i32) -> (i32, i32) {
    %c0_i32 = arith.constant 0 : i32
    %c0_i32_0 = arith.constant 0 : i32
    %c0_i32_1 = arith.constant 0 : i32
    return %c0_i32, %c0_i32_0 : i32, i32
  }
  func.func @transform_4(%arg0: i32) -> (i32, i32) {
    %c0_i32 = arith.constant 0 : i32
    %c0_i32_0 = arith.constant 0 : i32
    %c0_i32_1 = arith.constant 0 : i32
    return %c0_i32, %c0_i32_0 : i32, i32
  }
  func.func @transform_5(%arg0: i32) -> (i32, i32) {
    %c0_i32 = arith.constant 0 : i32
    %c0_i32_0 = arith.constant 0 : i32
    %c0_i32_1 = arith.constant 0 : i32
    return %c0_i32, %c0_i32_0 : i32, i32
  }
  func.func @transform_6(%arg0: i32) -> (i32, i32) {
    %c0_i32 = arith.constant 0 : i32
    %c0_i32_0 = arith.constant 0 : i32
    %c0_i32_1 = arith.constant 0 : i32
    return %c0_i32, %c0_i32_0 : i32, i32
  }
  func.func @transform_7(%arg0: i32) -> (i32, i32) {
    %c0_i32 = arith.constant 0 : i32
    %c0_i32_0 = arith.constant 0 : i32
    %c0_i32_1 = arith.constant 0 : i32
    return %c0_i32, %c0_i32_0 : i32, i32
  }
}

</mosaic_0001>

<bundles_post_ra>
// kernel: tile.23
= control target key start
LH: loop header
LB: loop body
LE: loop exit
PB: predicated region body
PF: predicated region fallthrough
CT: control target
= control target key end

     0   :  { %s64_s0 = inlined_call_operand.vmem [shape: f32[4], index: 0, kind: input, shape index: {}]   ;;  %s65_s1 = inlined_call_operand.vmem [shape: f32[64,4], index: 1, kind: output, shape index: {}]  }
   0x1   :  { %v4_v0 = vld [vmem:[%s64_s0] ss:$0 sm:$0xff] }
   0x2   :  { %5 = vst [vmem:[%s65_s1] sm:$0xff] %v4_v0  ;;  %20 = vst [vmem:[%s65_s1 + $0x8] sm:$0xff] %v4_v0 }
   0x3   :  { %21 = vst [vmem:[%s65_s1 + $0x10] sm:$0xff] %v4_v0  ;;  %22 = vst [vmem:[%s65_s1 + $0x18] sm:$0xff] %v4_v0 }
   0x4   :  { %23 = vst [vmem:[%s65_s1 + $0x20] sm:$0xff] %v4_v0  ;;  %24 = vst [vmem:[%s65_s1 + $0x28] sm:$0xff] %v4_v0 }
   0x5   :  { %25 = vst [vmem:[%s65_s1 + $0x30] sm:$0xff] %v4_v0  ;;  %26 = vst [vmem:[%s65_s1 + $0x38] sm:$0xff] %v4_v0 }

// kernel: tile.24
= control target key start
LH: loop header
LB: loop body
LE: loop exit
PB: predicated region body
PF: predicated region fallthrough
CT: control target
= control target key end

     0   :  { %vm5_vm0 = vcmask 1041409   ;;  %s428_s14 = smov 124   ;;  %s429_s21 = smov 116   ;;  %vm7_vm1 = vcmask 31744   ;;  %vm17_vm2 = vcmask 1048544   ;;  %vm27_vm3 = vcmask 1015744   ;;  %s699_s0 = inlined_call_operand.vmem [shape: f32[64,4], index: 0, kind: input, shape index: {}]   ;;  %s700_s1 = inlined_call_operand.vmem [shape: f32[1,256], index: 1, kind: output, shape index: {}]  }
   0x1   :  { %v334_v0 = vld [vmem:[%s699_s0 + $0x1f] sm:$0x1]   ;;  %v338_v3 = vld [vmem:[%s699_s0 + $0x1d] sm:$0x1]   ;;  %v336_v6 = vld [vmem:[%s699_s0 + $0x1e] sm:$0x1]  }
   0x2   :  { %v335_v1 = vld [vmem:[%s699_s0 + $0x3e] sm:$0x2]   ;;  %v339_v4 = vld [vmem:[%s699_s0 + $0x3c] sm:$0x2]   ;;  %v337_v7 = vld [vmem:[%s699_s0 + $0x3d] sm:$0x2]  }
   0x3   :  { %v14_v2 = vsel %vm5_vm0, %v335_v1, %v334_v0  ;;  %v34_v5 = vsel %vm5_vm0, %v339_v4, %v338_v3  ;;  %v340_v8 = vld [vmem:[%s699_s0 + $0x1c] sm:$0x1]   ;;  %v24_v9 = vsel %vm5_vm0, %v337_v7, %v336_v6  ;;  %v342_v12 = vld [vmem:[%s699_s0 + $0x1b] sm:$0x1]   ;;  %v344_v14 = vld [vmem:[%s699_s0 + $0x1a] sm:$0x1]  }
   0x4   :  { %15 = vrot.lane.b32.xlu0 %v14_v2, %s428_s14  ;;  %35 = vrot.lane.b32.xlu1 %v34_v5, %s429_s21  ;;  %v341_v10 = vld [vmem:[%s699_s0 + $0x3b] sm:$0x2]   ;;  %v343_v13 = vld [vmem:[%s699_s0 + $0x3a] sm:$0x2]   ;;  %s430_s3 = smov 120   ;;  %s431_s4 = smov 112  }
   0x5   :  { %v44_v11 = vsel %vm5_vm0, %v341_v10, %v340_v8  ;;  %v345_v15 = vld [vmem:[%s699_s0 + $0x39] sm:$0x2]   ;;  %v54_v16 = vsel %vm5_vm0, %v343_v13, %v342_v12  ;;  %v346_v18 = vld [vmem:[%s699_s0 + $0x19] sm:$0x1]   ;;  %v348_v20 = vld [vmem:[%s699_s0 + $0x18] sm:$0x1]  }
   0x6   :  { %v64_v17 = vsel %vm5_vm0, %v345_v15, %v344_v14  ;;  %v347_v19 = vld [vmem:[%s699_s0 + $0x38] sm:$0x2]   ;;  %v349_v21 = vld [vmem:[%s699_s0 + $0x37] sm:$0x2]   ;;  %s432_s13 = smov 108   ;;  %s433_s14 = smov 104  }
   0x7   :  { %v74_v22 = vsel %vm5_vm0, %v347_v19, %v346_v18  ;;  %v84_v23 = vsel %vm5_vm0, %v349_v21, %v348_v20  ;;  %v350_v24 = vld [vmem:[%s699_s0 + $0x17] sm:$0x1]   ;;  %v352_v26 = vld [vmem:[%s699_s0 + $0x16] sm:$0x1]   ;;  %s434_s23 = smov 100   ;;  %s435_s24 = smov 96  }
   0x8   :  { %25 = vrot.lane.b32.xlu0 %v24_v9, %s430_s3  ;;  %45 = vrot.lane.b32.xlu1 %v44_v11, %s431_s4  ;;  %v351_v25 = vld [vmem:[%s699_s0 + $0x36] sm:$0x2]   ;;  %v353_v27 = vld [vmem:[%s699_s0 + $0x35] sm:$0x2]   ;;  %s436_s4 = smov 92   ;;  %s437_s5 = smov 88  }
   0x9   :  { %v94_v28 = vsel %vm5_vm0, %v351_v25, %v350_v24  ;;  %v104_v29 = vsel %vm5_vm0, %v353_v27, %v352_v26  ;;  %v354_v30 = vld [vmem:[%s699_s0 + $0x15] sm:$0x1]   ;;  %v356_v32 = vld [vmem:[%s699_s0 + $0x14] sm:$0x1]   ;;  %v358_v36 = vld [vmem:[%s699_s0 + $0x13] sm:$0x1]  }
   0xa   :  { %v355_v31 = vld [vmem:[%s699_s0 + $0x34] sm:$0x2]   ;;  %v357_v33 = vld [vmem:[%s699_s0 + $0x33] sm:$0x2]   ;;  %v359_v37 = vld [vmem:[%s699_s0 + $0x32] sm:$0x2]  }
   0xb   :  { %v114_v34 = vsel %vm5_vm0, %v355_v31, %v354_v30  ;;  %v124_v35 = vsel %vm5_vm0, %v357_v33, %v356_v32  ;;  %v360_v38 = vld [vmem:[%s699_s0 + $0x12] sm:$0x1]   ;;  %s439_s15 = smov 80   ;;  %v134_v40 = vsel %vm5_vm0, %v359_v37, %v358_v36  ;;  %v362_v42 = vld [vmem:[%s699_s0 + $0x11] sm:$0x1]   ;;  %s441_s29 = smov 72  }
   0xc   :  { %55 = vrot.lane.b32.xlu0 %v54_v16, %s432_s13  ;;  %65 = vrot.lane.b32.xlu1 %v64_v17, %s433_s14  ;;  %v361_v39 = vld [vmem:[%s699_s0 + $0x31] sm:$0x2]   ;;  %s438_s14 = smov 84   ;;  %v363_v43 = vld [vmem:[%s699_s0 + $0x30] sm:$0x2]   ;;  %s442_s9 = smov 68  }
   0xd   :  { %v144_v41 = vsel %vm5_vm0, %v361_v39, %v360_v38  ;;  %v364_v44 = vld [vmem:[%s699_s0 + $0x10] sm:$0x1]   ;;  %v2_v46 = vld [vmem:[%s699_s0] sm:$0x1]   ;;  %v154_v48 = vsel %vm5_vm0, %v363_v43, %v362_v42  ;;  %v366_v51 = vld [vmem:[%s699_s0 + $0xf] sm:$0x1]  }
   0xe   :  { %v365_v45 = vld [vmem:[%s699_s0 + $0x2f] sm:$0x2]   ;;  %v333_v47 = vld [vmem:[%s699_s0 + $0x1f] sm:$0x2]   ;;  %v367_v52 = vld [vmem:[%s699_s0 + $0x2e] sm:$0x2]  }
   0xf   :  { %v6_v49 = vsel %vm5_vm0, %v333_v47, %v2_v46  ;;  %v164_v50 = vsel %vm5_vm0, %v365_v45, %v364_v44  ;;  %v368_v53 = vld [vmem:[%s699_s0 + $0xe] sm:$0x1]   ;;  %s443_s10 = smov 64   ;;  %v174_v55 = vsel %vm5_vm0, %v367_v52, %v366_v51  ;;  %v370_v57 = vld [vmem:[%s699_s0 + $0xd] sm:$0x1]   ;;  %s444_s19 = smov 60  }
  0x10   :  { %75 = vrot.lane.b32.xlu0 %v74_v22, %s434_s23  ;;  %85 = vrot.lane.b32.xlu1 %v84_v23, %s435_s24  ;;  %s440_s24 = smov 76   ;;  %8 = vst.msk [vmem:[#allocation0] ss:$8 sm:$0x3] %vm7_vm1, %v6_v49   ;;  %v369_v54 = vld [vmem:[%s699_s0 + $0x2d] sm:$0x2]  }
  0x11   :  { %v184_v56 = vsel %vm5_vm0, %v369_v54, %v368_v53  ;;  %v371_v58 = vld [vmem:[%s699_s0 + $0x2c] sm:$0x2]   ;;  %v372_v59 = vld [vmem:[%s699_s0 + $0xc] sm:$0x1]   ;;  %s445_s20 = smov 56   ;;  %s447_s30 = smov 48  }
  0x12   :  { %v373_v60 = vld [vmem:[%s699_s0 + $0x2b] sm:$0x2]   ;;  %v194_v61 = vsel %vm5_vm0, %v371_v58, %v370_v57  ;;  %v374_v63 = vld [vmem:[%s699_s0 + $0xb] sm:$0x1]   ;;  %v376_v1 = vld [vmem:[%s699_s0 + $0xa] sm:$0x1]  }
  0x13   :  { %v204_v62 = vsel %vm5_vm0, %v373_v60, %v372_v59  ;;  %v375_v0 = vld [vmem:[%s699_s0 + $0x2a] sm:$0x2]   ;;  %v377_v2 = vld [vmem:[%s699_s0 + $0x29] sm:$0x2]   ;;  %v378_v5 = vld [vmem:[%s699_s0 + $0x9] sm:$0x1]  }
  0x14   :  { %95 = vrot.lane.b32.xlu0 %v94_v28, %s436_s4  ;;  %105 = vrot.lane.b32.xlu1 %v104_v29, %s437_s5  ;;  %v214_v3 = vsel %vm5_vm0, %v375_v0, %v374_v63  ;;  %v224_v4 = vsel %vm5_vm0, %v377_v2, %v376_v1  ;;  %v379_v6 = vld [vmem:[%s699_s0 + $0x28] sm:$0x2]   ;;  %v380_v7 = vld [vmem:[%s699_s0 + $0x8] sm:$0x1]   ;;  %s449_s11 = smov 40   ;;  %s451_s21 = smov 32  }
  0x15   :  { %v381_v8 = vld [vmem:[%s699_s0 + $0x27] sm:$0x2]   ;;  %v234_v9 = vsel %vm5_vm0, %v379_v6, %v378_v5  ;;  %v382_v11 = vld [vmem:[%s699_s0 + $0x7] sm:$0x1]   ;;  %v384_v13 = vld [vmem:[%s699_s0 + $0x6] sm:$0x1]  }
  0x16   :  { %v244_v10 = vsel %vm5_vm0, %v381_v8, %v380_v7  ;;  %v383_v12 = vld [vmem:[%s699_s0 + $0x26] sm:$0x2]   ;;  %v385_v14 = vld [vmem:[%s699_s0 + $0x25] sm:$0x2]   ;;  %v386_v17 = vld [vmem:[%s699_s0 + $0x5] sm:$0x1]  }
  0x17   :  { %v254_v15 = vsel %vm5_vm0, %v383_v12, %v382_v11  ;;  %v264_v16 = vsel %vm5_vm0, %v385_v14, %v384_v13  ;;  %v387_v18 = vld [vmem:[%s699_s0 + $0x24] sm:$0x2]   ;;  %v388_v19 = vld [vmem:[%s699_s0 + $0x4] sm:$0x1]   ;;  %s453_s2 = smov 24   ;;  %s455_s12 = smov 16  }
  0x18   :  { %115 = vrot.lane.b32.xlu0 %v114_v34, %s438_s14  ;;  %125 = vrot.lane.b32.xlu1 %v124_v35, %s439_s15  ;;  %v389_v20 = vld [vmem:[%s699_s0 + $0x23] sm:$0x2]   ;;  %v274_v21 = vsel %vm5_vm0, %v387_v18, %v386_v17  ;;  %v390_v23 = vld [vmem:[%s699_s0 + $0x3] sm:$0x1]   ;;  %s457_s17 = smov 8   ;;  %s458_s18 = smov 4  }
  0x19   :  { %v284_v22 = vsel %vm5_vm0, %v389_v20, %v388_v19  ;;  %v391_v24 = vld [vmem:[%s699_s0 + $0x22] sm:$0x2]   ;;  %v392_v25 = vld [vmem:[%s699_s0 + $0x2] sm:$0x1]   ;;  %v394_v29 = vld [vmem:[%s699_s0 + $0x1] sm:$0x1]  }
  0x1a   :  { %v393_v26 = vld [vmem:[%s699_s0 + $0x21] sm:$0x2]   ;;  %v294_v27 = vsel %vm5_vm0, %v391_v24, %v390_v23  ;;  %v395_v30 = vld [vmem:[%s699_s0 + $0x20] sm:$0x2]   ;;  %s456_s0 = smov 12   ;;  %vm37_vm4 = vcmask 982944  }
  0x1b   :  { %v304_v28 = vsel %vm5_vm0, %v393_v26, %v392_v25  ;;  %v314_v31 = vsel %vm5_vm0, %v395_v30, %v394_v29  ;;  %vm47_vm5 = vcmask 950144   ;;  %vm57_vm6 = vcmask 917344  }
  0x1c   :  { %135 = vrot.lane.b32.xlu0 %v134_v40, %s440_s24  ;;  %145 = vrot.lane.b32.xlu1 %v144_v41, %s441_s29  ;;  %s446_s29 = smov 52   ;;  %vm67_vm7 = vcmask 884544   ;;  %vm77_vm8 = vcmask 851744   ;;  %vm87_vm9 = vcmask 818944   ;;  %vm97_vm10 = vcmask 786144  }
  0x1d   :  { %vm107_vm11 = vcmask 753344   ;;  %vm117_vm12 = vcmask 720544   ;;  %vm127_vm13 = vcmask 687744   ;;  %vm137_vm14 = vcmask 654944  }
  0x1e   :  { %vm147_vm15 = vcmask 622144   ;;  %vm157_vm0 = vcmask 589344   ;;  %vm167_vm1 = vcmask 556544  }
  0x20   :  { %155 = vrot.lane.b32.xlu0 %v154_v48, %s442_s9  ;;  %165 = vrot.lane.b32.xlu1 %v164_v50, %s443_s10  ;;  %s448_s10 = smov 44  }
  0x24   :  { %175 = vrot.lane.b32.xlu0 %v174_v55, %s444_s19  ;;  %185 = vrot.lane.b32.xlu1 %v184_v56, %s445_s20  ;;  %s450_s20 = smov 36  }
  0x28   :  { %195 = vrot.lane.b32.xlu0 %v194_v61, %s446_s29  ;;  %205 = vrot.lane.b32.xlu1 %v204_v62, %s447_s30  ;;  %s452_s30 = smov 28  }
  0x2c   :  { %215 = vrot.lane.b32.xlu0 %v214_v3, %s448_s10  ;;  %225 = vrot.lane.b32.xlu1 %v224_v4, %s449_s11  ;;  %s454_s11 = smov 20  }
  0x30   :  { %235 = vrot.lane.b32.xlu0 %v234_v9, %s450_s20  ;;  %245 = vrot.lane.b32.xlu1 %v244_v10, %s451_s21 }
  0x34   :  { %255 = vrot.lane.b32.xlu0 %v254_v15, %s452_s30  ;;  %265 = vrot.lane.b32.xlu1 %v264_v16, %s453_s2 }
  0x38   :  { %275 = vrot.lane.b32.xlu0 %v274_v21, %s454_s11  ;;  %285 = vrot.lane.b32.xlu1 %v284_v22, %s455_s12 }
  0x3c   :  { %295 = vrot.lane.b32.xlu0 %v294_v27, %s456_s0  ;;  %305 = vrot.lane.b32.xlu1 %v304_v28, %s457_s17 }
  0x40   :  { %315 = vrot.lane.b32.xlu0 %v314_v31, %s458_s18 }
  0x76   :  { %v16_v32 = vpop.permute.xlu0 %15   ;;  %v36_v33 = vpop.permute.xlu1 %35  }
  0x77   :  { %18 = vst.msk [vmem:[#allocation0] ss:$8 sm:$0x3] %vm17_vm2, %v16_v32   ;;  %vm177_vm2 = vcmask 523744  }
  0x7a   :  { %v26_v34 = vpop.permute.xlu0 %25   ;;  %v46_v35 = vpop.permute.xlu1 %45  }
  0x7b   :  { %28 = vst.msk [vmem:[#allocation0] ss:$8 sm:$0x3] %vm27_vm3, %v26_v34   ;;  %vm187_vm3 = vcmask 490944  }
  0x7c   :  { %38 = vst.msk [vmem:[#allocation0] ss:$8 sm:$0x3] %vm37_vm4, %v36_v33   ;;  %vm197_vm4 = vcmask 458144  }
  0x7d   :  { %48 = vst.msk [vmem:[#allocation0] ss:$8 sm:$0x3] %vm47_vm5, %v46_v35   ;;  %vm207_vm5 = vcmask 425344  }
  0x7e   :  { %v56_v36 = vpop.permute.xlu0 %55   ;;  %v66_v37 = vpop.permute.xlu1 %65  }
  0x7f   :  { %58 = vst.msk [vmem:[#allocation0] ss:$8 sm:$0x3] %vm57_vm6, %v56_v36   ;;  %vm217_vm6 = vcmask 392544  }
  0x80   :  { %68 = vst.msk [vmem:[#allocation0] ss:$8 sm:$0x3] %vm67_vm7, %v66_v37   ;;  %vm227_vm7 = vcmask 359744  }
  0x82   :  { %v76_v38 = vpop.permute.xlu0 %75   ;;  %v86_v39 = vpop.permute.xlu1 %85  }
  0x83   :  { %78 = vst.msk [vmem:[#allocation0] ss:$8 sm:$0x3] %vm77_vm8, %v76_v38   ;;  %vm237_vm8 = vcmask 326944  }
  0x84   :  { %88 = vst.msk [vmem:[#allocation0] ss:$8 sm:$0x3] %vm87_vm9, %v86_v39   ;;  %vm247_vm9 = vcmask 294144  }
  0x86   :  { %v96_v40 = vpop.permute.xlu0 %95   ;;  %v106_v41 = vpop.permute.xlu1 %105  }
  0x87   :  { %98 = vst.msk [vmem:[#allocation0] ss:$8 sm:$0x3] %vm97_vm10, %v96_v40   ;;  %vm257_vm10 = vcmask 261344  }
  0x88   :  { %108 = vst.msk [vmem:[#allocation0] ss:$8 sm:$0x3] %vm107_vm11, %v106_v41   ;;  %vm267_vm11 = vcmask 228544  }
  0x8a   :  { %v116_v42 = vpop.permute.xlu0 %115   ;;  %v126_v43 = vpop.permute.xlu1 %125  }
  0x8b   :  { %118 = vst.msk [vmem:[#allocation0] ss:$8 sm:$0x3] %vm117_vm12, %v116_v42   ;;  %vm277_vm12 = vcmask 195744  }
  0x8c   :  { %128 = vst.msk [vmem:[#allocation0] ss:$8 sm:$0x3] %vm127_vm13, %v126_v43   ;;  %vm287_vm13 = vcmask 162944  }
  0x8e   :  { %v136_v44 = vpop.permute.xlu0 %135   ;;  %v146_v45 = vpop.permute.xlu1 %145  }
  0x8f   :  { %138 = vst.msk [vmem:[#allocation0] ss:$8 sm:$0x3] %vm137_vm14, %v136_v44   ;;  %vm297_vm14 = vcmask 130144  }
  0x90   :  { %148 = vst.msk [vmem:[#allocation0] ss:$8 sm:$0x3] %vm147_vm15, %v146_v45   ;;  %vm307_vm15 = vcmask 97344  }
  0x92   :  { %v156_v46 = vpop.permute.xlu0 %155   ;;  %v166_v47 = vpop.permute.xlu1 %165  }
  0x93   :  { %158 = vst.msk [vmem:[#allocation0] ss:$8 sm:$0x3] %vm157_vm0, %v156_v46   ;;  %vm317_vm0 = vcmask 64544  }
  0x94   :  { %168 = vst.msk [vmem:[#allocation0] ss:$8 sm:$0x3] %vm167_vm1, %v166_v47  }
  0x96   :  { %v176_v48 = vpop.permute.xlu0 %175   ;;  %v186_v49 = vpop.permute.xlu1 %185  }
  0x97   :  { %178 = vst.msk [vmem:[#allocation0] ss:$8 sm:$0x3] %vm177_vm2, %v176_v48  }
  0x98   :  { %188 = vst.msk [vmem:[#allocation0] ss:$8 sm:$0x3] %vm187_vm3, %v186_v49  }
  0x9a   :  { %v196_v50 = vpop.permute.xlu0 %195   ;;  %v206_v51 = vpop.permute.xlu1 %205  }
  0x9b   :  { %198 = vst.msk [vmem:[#allocation0] ss:$8 sm:$0x3] %vm197_vm4, %v196_v50  }
  0x9c   :  { %208 = vst.msk [vmem:[#allocation0] ss:$8 sm:$0x3] %vm207_vm5, %v206_v51  }
  0x9e   :  { %v216_v52 = vpop.permute.xlu0 %215   ;;  %v226_v53 = vpop.permute.xlu1 %225  }
  0x9f   :  { %218 = vst.msk [vmem:[#allocation0] ss:$8 sm:$0x3] %vm217_vm6, %v216_v52  }
  0xa0   :  { %228 = vst.msk [vmem:[#allocation0] ss:$8 sm:$0x3] %vm227_vm7, %v226_v53  }
  0xa2   :  { %v236_v54 = vpop.permute.xlu0 %235   ;;  %v246_v55 = vpop.permute.xlu1 %245  }
  0xa3   :  { %238 = vst.msk [vmem:[#allocation0] ss:$8 sm:$0x3] %vm237_vm8, %v236_v54  }
  0xa4   :  { %248 = vst.msk [vmem:[#allocation0] ss:$8 sm:$0x3] %vm247_vm9, %v246_v55  }
  0xa6   :  { %v256_v56 = vpop.permute.xlu0 %255   ;;  %v266_v57 = vpop.permute.xlu1 %265  }
  0xa7   :  { %258 = vst.msk [vmem:[#allocation0] ss:$8 sm:$0x3] %vm257_vm10, %v256_v56  }
  0xa8   :  { %268 = vst.msk [vmem:[#allocation0] ss:$8 sm:$0x3] %vm267_vm11, %v266_v57  }
  0xaa   :  { %v276_v58 = vpop.permute.xlu0 %275   ;;  %v286_v59 = vpop.permute.xlu1 %285  }
  0xab   :  { %278 = vst.msk [vmem:[#allocation0] ss:$8 sm:$0x3] %vm277_vm12, %v276_v58  }
  0xac   :  { %288 = vst.msk [vmem:[#allocation0] ss:$8 sm:$0x3] %vm287_vm13, %v286_v59  }
  0xae   :  { %v296_v60 = vpop.permute.xlu0 %295   ;;  %v306_v61 = vpop.permute.xlu1 %305  }
  0xaf   :  { %298 = vst.msk [vmem:[#allocation0] ss:$8 sm:$0x3] %vm297_vm14, %v296_v60  }
  0xb0   :  { %308 = vst.msk [vmem:[#allocation0] ss:$8 sm:$0x3] %vm307_vm15, %v306_v61  }
  0xb2   :  { %v316_v62 = vpop.permute.xlu0 %315  }
  0xb3   :  { %318 = vst.msk [vmem:[#allocation0] ss:$8 sm:$0x3] %vm317_vm0, %v316_v62  }
  0xba   :  { %v323_v63 = vld [vmem:[#allocation0] sm:$0x1]  ;;  %v328_v0 = vld [vmem:[#allocation0 + $0x8] sm:$0x1] }
  0xbb   :  { %326 = vst [vmem:[%s700_s1] sm:$0x1] %v323_v63  ;;  %396 = vst [vmem:[%s700_s1 + $0x1] sm:$0x1] %v328_v0 }

// kernel: residual_block_forward.1
= control target key start
LH: loop header
LB: loop body
LE: loop exit
PB: predicated region body
PF: predicated region fallthrough
CT: control target
= control target key end

     0   :  { %v29_v38 = vlaneseq  ;;  %vm61_vm0 = vsmask.f32 256  ;;  %vm60_vm1 = vcmask 1040384   ;;  %vm63_vm2 = vcmask 1044484   ;;  %v67_v47 = vld [vmem:[#allocation2 + $0x8] sm:$0x11]  ;;  %s3705_s1 = inlined_call_operand.vmem [shape: bf16[768,256], index: 1, kind: input, shape index: {}]   ;;  %s3706_s0 = inlined_call_operand.vmem [shape: f32[16,256], index: 0, kind: input, shape index: {}]   ;;  %s3707_s2 = inlined_call_operand.vmem [shape: bf16[768,256], index: 2, kind: input, shape index: {}]   ;;  %s3708_s3 = inlined_call_operand.vmem [shape: f32[1,256], index: 3, kind: input, shape index: {}]   ;;  %s3709_s4 = inlined_call_operand.vmem [shape: f32[1,256], index: 4, kind: input, shape index: {}]   ;;  %s3710_s5 = inlined_call_operand.vmem [shape: f32[1,256], index: 5, kind: input, shape index: {}]   ;;  %s3711_s6 = inlined_call_operand.vmem [shape: f32[1,256], index: 6, kind: input, shape index: {}]   ;;  %s3712_s7 = inlined_call_operand.vmem [shape: f32[16,256], index: 7, kind: output, shape index: {}]  }
   0x1   :  { %v2369_v0 = vld [vmem:[%s3705_s1 + $0x74] ss:$8 sps:$4 sm:$0xff]   ;;  %v2373_v2 = vld [vmem:[%s3705_s1 + $0x70] ss:$8 sps:$4 sm:$0xff]   ;;  %v2375_v4 = vld [vmem:[%s3705_s1 + $0x64] ss:$8 sps:$4 sm:$0xff]  }
   0x2   :  { %v2371_v1 = vld [vmem:[%s3705_s1 + $0x174] ss:$8 sps:$4 sm:$0xff]   ;;  %786 = vmatprep.subr.bf16.mxu0 %v2369_v0  ;;  %v2374_v3 = vld [vmem:[%s3705_s1 + $0x170] ss:$8 sps:$4 sm:$0xff]   ;;  %v2377_v5 = vld [vmem:[%s3705_s1 + $0x164] ss:$8 sps:$4 sm:$0xff]  }
   0x3   :  { %829 = vmatprep.subr.bf16.mxu1 %v2371_v1  ;;  %787 = vmatpush1.bf16.msra.mxu0 %v2373_v2  ;;  %v2379_v6 = vld [vmem:[%s3705_s1 + $0x60] ss:$8 sps:$4 sm:$0xff]   ;;  %v2381_v8 = vld [vmem:[%s3705_s1 + $0x54] ss:$8 sps:$4 sm:$0xff]   ;;  %v2385_v10 = vld [vmem:[%s3705_s1 + $0x50] ss:$8 sps:$4 sm:$0xff]  }
   0x4   :  { %830 = vmatpush1.bf16.msra.mxu1 %v2374_v3  ;;  %788 = vmatprep.subr.bf16.mxu0 %v2375_v4  ;;  %v2380_v7 = vld [vmem:[%s3705_s1 + $0x160] ss:$8 sps:$4 sm:$0xff]   ;;  %v2383_v9 = vld [vmem:[%s3705_s1 + $0x154] ss:$8 sps:$4 sm:$0xff]   ;;  %v2386_v11 = vld [vmem:[%s3705_s1 + $0x150] ss:$8 sps:$4 sm:$0xff]  }
   0x5   :  { %831 = vmatprep.subr.bf16.mxu1 %v2377_v5  ;;  %v2387_v12 = vld [vmem:[%s3705_s1 + $0x44] ss:$8 sps:$4 sm:$0xff]   ;;  %v2391_v14 = vld [vmem:[%s3705_s1 + $0x40] ss:$8 sps:$4 sm:$0xff]   ;;  %v2393_v16 = vld [vmem:[%s3705_s1 + $0x34] ss:$8 sps:$4 sm:$0xff]  }
   0x6   :  { %v2389_v13 = vld [vmem:[%s3705_s1 + $0x144] ss:$8 sps:$4 sm:$0xff]   ;;  %v2392_v15 = vld [vmem:[%s3705_s1 + $0x140] ss:$8 sps:$4 sm:$0xff]   ;;  %v2395_v17 = vld [vmem:[%s3705_s1 + $0x134] ss:$8 sps:$4 sm:$0xff]  }
   0x7   :  { %789 = vmatpush1.bf16.msra.mxu0 %v2379_v6  ;;  %v2397_v18 = vld [vmem:[%s3705_s1 + $0x30] ss:$8 sps:$4 sm:$0xff]   ;;  %v2399_v20 = vld [vmem:[%s3705_s1 + $0x24] ss:$8 sps:$4 sm:$0xff]   ;;  %v2403_v22 = vld [vmem:[%s3705_s1 + $0x20] ss:$8 sps:$4 sm:$0xff]  }
   0x8   :  { %832 = vmatpush1.bf16.msra.mxu1 %v2380_v7  ;;  %790 = vmatprep.subr.bf16.mxu0 %v2381_v8  ;;  %v2398_v19 = vld [vmem:[%s3705_s1 + $0x130] ss:$8 sps:$4 sm:$0xff]   ;;  %v2401_v21 = vld [vmem:[%s3705_s1 + $0x124] ss:$8 sps:$4 sm:$0xff]   ;;  %v2404_v23 = vld [vmem:[%s3705_s1 + $0x120] ss:$8 sps:$4 sm:$0xff]  }
   0x9   :  { %833 = vmatprep.subr.bf16.mxu1 %v2383_v9  ;;  %v2405_v24 = vld [vmem:[%s3705_s1 + $0x14] ss:$8 sps:$4 sm:$0xff]   ;;  %v2409_v26 = vld [vmem:[%s3705_s1 + $0x10] ss:$8 sps:$4 sm:$0xff]   ;;  %v2411_v28 = vld [vmem:[%s3705_s1 + $0x4] ss:$8 sps:$4 sm:$0xff]  }
   0xa   :  { %v2407_v25 = vld [vmem:[%s3705_s1 + $0x114] ss:$8 sps:$4 sm:$0xff]   ;;  %v2410_v27 = vld [vmem:[%s3705_s1 + $0x110] ss:$8 sps:$4 sm:$0xff]   ;;  %v2413_v29 = vld [vmem:[%s3705_s1 + $0x104] ss:$8 sps:$4 sm:$0xff]  }
   0xb   :  { %791 = vmatpush1.bf16.msra.mxu0 %v2385_v10  ;;  %v2415_v30 = vld [vmem:[%s3705_s1] ss:$8 sps:$4 sm:$0xff]   ;;  %v2417_v32 = vld [vmem:[%s3705_s1 + $0xf4] ss:$8 sps:$4 sm:$0xff]   ;;  %v2421_v34 = vld [vmem:[%s3705_s1 + $0xf0] ss:$8 sps:$4 sm:$0xff]  }
   0xc   :  { %834 = vmatpush1.bf16.msra.mxu1 %v2386_v11  ;;  %792 = vmatprep.subr.bf16.mxu0 %v2387_v12  ;;  %v2416_v31 = vld [vmem:[%s3705_s1 + $0x100] ss:$8 sps:$4 sm:$0xff]   ;;  %v2419_v33 = vld [vmem:[%s3705_s1 + $0x1f4] ss:$8 sps:$4 sm:$0xff]   ;;  %v2422_v35 = vld [vmem:[%s3705_s1 + $0x1f0] ss:$8 sps:$4 sm:$0xff]  }
   0xd   :  { %835 = vmatprep.subr.bf16.mxu1 %v2389_v13  ;;  %v2423_v36 = vld [vmem:[%s3705_s1 + $0xe4] ss:$8 sps:$4 sm:$0xff]   ;;  %v2427_v39 = vld [vmem:[%s3705_s1 + $0xe0] ss:$8 sps:$4 sm:$0xff]   ;;  %v2429_v41 = vld [vmem:[%s3705_s1 + $0xd4] ss:$8 sps:$4 sm:$0xff]  }
   0xe   :  { %v2425_v37 = vld [vmem:[%s3705_s1 + $0x1e4] ss:$8 sps:$4 sm:$0xff]   ;;  %v2428_v40 = vld [vmem:[%s3705_s1 + $0x1e0] ss:$8 sps:$4 sm:$0xff]   ;;  %v2431_v42 = vld [vmem:[%s3705_s1 + $0x1d4] ss:$8 sps:$4 sm:$0xff]  }
   0xf   :  { %793 = vmatpush1.bf16.msra.mxu0 %v2391_v14  ;;  %v2839_v43 = vshrl.u32 %v29_v38, 7  ;;  %v2433_v44 = vld [vmem:[%s3705_s1 + $0xd0] ss:$8 sps:$4 sm:$0xff]   ;;  %v2435_v46 = vld [vmem:[%s3705_s1 + $0xc4] ss:$8 sps:$4 sm:$0xff]   ;;  %vm62_vm4 = vmand %vm60_vm1, %vm61_vm0  ;;  %vm114_vm12 = vcmask 1043456  }
  0x10   :  { %836 = vmatpush1.bf16.msra.mxu1 %v2392_v15  ;;  %794 = vmatprep.subr.bf16.mxu0 %v2393_v16  ;;  %v2434_v45 = vld [vmem:[%s3705_s1 + $0x1d0] ss:$8 sps:$4 sm:$0xff]   ;;  %vm64_vm3 = vsmask.f32 4352  ;;  %v2437_v48 = vld [vmem:[%s3705_s1 + $0x1c4] ss:$8 sps:$4 sm:$0xff]  }
  0x11   :  { %837 = vmatprep.subr.bf16.mxu1 %v2395_v17  ;;  %v2439_v49 = vld [vmem:[%s3705_s1 + $0xc0] ss:$8 sps:$4 sm:$0xff]   ;;  %v31_v51 = vadd.s32 8, %v2839_v43  ;;  %v2441_v52 = vld [vmem:[%s3705_s1 + $0xb4] ss:$8 sps:$4 sm:$0xff]   ;;  %vm65_vm5 = vmand %vm63_vm2, %vm64_vm3  ;;  %v36_v59 = vand.u32 7, %v2839_v43 }
  0x12   :  { %v2440_v50 = vld [vmem:[%s3705_s1 + $0x1c0] ss:$8 sps:$4 sm:$0xff]   ;;  %v2443_v53 = vld [vmem:[%s3705_s1 + $0x1b4] ss:$8 sps:$4 sm:$0xff]   ;;  %vm2874_vm6 = vmor %vm65_vm5, %vm62_vm4  ;;  %vm70_vm7 = vsmask.f32 7938 }
  0x13   :  { %795 = vmatpush1.bf16.msra.mxu0 %v2397_v18  ;;  %v75_v54 = vld [vmem:[#allocation2] sm:$0x11]  ;;  %vm72_vm8 = vsmask.f32 7954  ;;  %v79_v57 = vld [vmem:[%s3706_s0 + $0x8] sm:$0xff]  ;;  %v2884_v58 = vld [vmem:[%s3706_s0 + $0x10] sm:$0xff] }
  0x14   :  { %838 = vmatpush1.bf16.msra.mxu1 %v2398_v19  ;;  %796 = vmatprep.subr.bf16.mxu0 %v2399_v20  ;;  %v2872_v55 = vld [vmem:[%s3706_s0] sm:$0xff]  ;;  %v68_v60 = vsel %vm2874_vm6, 0, %v67_v47  ;;  %vm2891_vm9 = vmand %vm60_vm1, %vm70_vm7  ;;  %v81_v62 = vld [vmem:[%s3706_s0 + $0x18] sm:$0xff]  ;;  %vm92_vm10 = vsmask.f32 4368  ;;  %v43_v1 = vand.u32 7, %v31_v51 }
  0x15   :  { %839 = vmatprep.subr.bf16.mxu1 %v2401_v21  ;;  %v2354_v63 = vpack.c.bf16 %v79_v57, %v2872_v55  ;;  %v2445_v0 = vld [vmem:[%s3705_s1 + $0xb0] ss:$8 sps:$4 sm:$0xff]   ;;  %69 = vst [vmem:[#allocation2 + $0x8] sm:$0x11] %v68_v60  ;;  %vm73_vm11 = vmand %vm63_vm2, %vm72_vm8  ;;  %v2355_v2 = vpack.c.bf16 %v81_v62, %v2884_v58  ;;  %v2359_v3 = vpack.c.bf16 %v81_v62, %v79_v57  ;;  %vm116_vm14 = vcmask 1047556   ;;  %s2667_s17 = smov 8  }
  0x16   :  { %v2446_v4 = vld [vmem:[%s3705_s1 + $0x1b0] ss:$8 sps:$4 sm:$0xff]   ;;  %vm74_vm13 = vmor %vm73_vm11, %vm2891_vm9  ;;  %v2447_v7 = vld [vmem:[%s3705_s1 + $0xa4] ss:$8 sps:$4 sm:$0xff]   ;;  %vm2922_vm3 = vcmp.ne.s32.totalorder %v36_v59, 0  ;;  %vm2935_vm4 = vcmp.ne.s32.totalorder %v43_v1, 0 }
  0x17   :  { %797 = vmatpush1.bf16.msra.mxu0 %v2403_v22  ;;  %v95_v5 = vshrl.u32 %v2354_v63, 16  ;;  %v98_v6 = vshll.u32 %v2354_v63, 16  ;;  %v76_v8 = vsel %vm74_vm13, 0, %v75_v54  ;;  %vm2915_vm15 = vmor %vm61_vm0, %vm92_vm10  ;;  %v103_v10 = vshrl.u32 %v2355_v2, 16  ;;  %v2449_v12 = vld [vmem:[%s3705_s1 + $0x1a4] ss:$8 sps:$4 sm:$0xff]   ;;  %861 = vmatprep.mubr.bf16.mxu1 %v2359_v3 }
  0x18   :  { %840 = vmatpush1.bf16.msra.mxu1 %v2404_v23  ;;  %798 = vmatprep.subr.bf16.mxu0 %v2405_v24  ;;  %v106_v11 = vshll.u32 %v2355_v2, 16  ;;  %77 = vst [vmem:[#allocation2] sm:$0x11] %v76_v8  ;;  %vm2928_vm0 = vmand %vm114_vm12, %vm70_vm7  ;;  %v2451_v16 = vld [vmem:[%s3705_s1 + $0xa0] ss:$8 sps:$4 sm:$0xff]   ;;  %vm2948_vm7 = vcmp.ne.s32.totalorder %v36_v59, 7  ;;  %v2358_v54 = vpack.c.bf16 %v2884_v58, %v2872_v55 }
  0x19   :  { %841 = vmatprep.subr.bf16.mxu1 %v2407_v25  ;;  %v97_v14 = vrot.slane %v95_v5, 7  ;;  %v105_v18 = vrot.slane %v103_v10, 7  ;;  %vm2941_vm5 = vmand %vm116_vm14, %vm72_vm8  ;;  %v2452_v20 = vld [vmem:[%s3705_s1 + $0x1a0] ss:$8 sps:$4 sm:$0xff]   ;;  %v2453_v24 = vld [vmem:[%s3705_s1 + $0x94] ss:$8 sps:$4 sm:$0xff]  }
  0x1a   :  { %vm118_vm9 = vmor %vm2941_vm5, %vm2928_vm0  ;;  %vm2959_vm8 = vcmp.ne.s32.totalorder %v43_v1, 7  ;;  %v2465_v57 = vld [vmem:[%s3705_s1 + $0x270] ss:$8 sps:$4 sm:$0xff]   ;;  %v2470_v61 = vld [vmem:[%s3705_s1 + $0x264] ss:$8 sps:$4 sm:$0xff]   ;;  %s2668_s18 = smov 16  }
  0x1b   :  { %799 = vmatpush1.bf16.msra.mxu0 %v2409_v26  ;;  %v100_v22 = vor.u32 %v98_v6, %v97_v14  ;;  %v101_v23 = vrot.slane %v97_v14, 4  ;;  %v108_v26 = vor.u32 %v106_v11, %v105_v18  ;;  %vm128_vm10 = vmpackc.low %vm2922_vm3, %vm2922_vm3  ;;  %v2468_v55 = vld [vmem:[%s3705_s1 + $0x260] ss:$8 sps:$4 sm:$0xff]   ;;  %v2473_v63 = vld [vmem:[%s3705_s1 + $0x254] ss:$8 sps:$4 sm:$0xff]   ;;  %s2669_s19 = smov 32  }
  0x1c   :  { %842 = vmatpush1.bf16.msra.mxu1 %v2410_v27  ;;  %800 = vmatprep.subr.bf16.mxu0 %v2411_v28  ;;  %v2455_v27 = vld [vmem:[%s3705_s1 + $0x194] ss:$8 sps:$4 sm:$0xff]   ;;  %v110_v28 = vrot.slane %v105_v18, 4  ;;  %vm129_vm11 = vmpackc.low %vm2935_vm4, %vm2935_vm4  ;;  %v2471_v3 = vld [vmem:[%s3705_s1 + $0x250] ss:$8 sps:$4 sm:$0xff]   ;;  %s2670_s20 = smov 64  }
  0x1d   :  { %843 = vmatprep.subr.bf16.mxu1 %v2413_v29  ;;  %v119_v29 = vld [vmem:[#allocation2 + $0x8] sm:$0xff]  ;;  %vm141_vm12 = vmpackc.low %vm2948_vm7, %vm2948_vm7  ;;  %v2479_v18 = vld [vmem:[%s3705_s1 + $0x234] ss:$8 sps:$4 sm:$0xff]  }
  0x1e   :  { %vm142_vm13 = vmpackc.low %vm2959_vm8, %vm2959_vm8  ;;  %v2474_v14 = vld [vmem:[%s3705_s1 + $0x240] ss:$8 sps:$4 sm:$0xff]   ;;  %v2482_v21 = vld [vmem:[%s3705_s1 + $0x224] ss:$8 sps:$4 sm:$0xff]  }
  0x1f   :  { %801 = vmatpush1.bf16.msra.mxu0 %v2415_v30  ;;  %v2457_v30 = vld [vmem:[%s3705_s1 + $0x90] ss:$8 sps:$4 sm:$0xff]   ;;  %vm145_vm14 = vmor %vm60_vm1, %vm63_vm2  ;;  %vm160_vm2 = vcmask 1042432   ;;  %v2488_v25 = vld [vmem:[%s3705_s1 + $0x204] ss:$8 sps:$4 sm:$0xff]  }
  0x20   :  { %844 = vmatpush1.bf16.msra.mxu1 %v2416_v31  ;;  %802 = vmatprep.subr.bf16.mxu0 %v2417_v32  ;;  %v109_v31 = vsel %vm2915_vm15, %v101_v23, %v108_v26  ;;  %v120_v32 = vsel %vm118_vm9, %v100_v22, %v119_v29  ;;  %v2480_v22 = vld [vmem:[%s3705_s1 + $0x220] ss:$8 sps:$4 sm:$0xff]   ;;  %v2485_v23 = vld [vmem:[%s3705_s1 + $0x214] ss:$8 sps:$4 sm:$0xff]   ;;  %v2494_v29 = vld [vmem:[%s3705_s1 + $0x2e4] ss:$8 sps:$4 sm:$0xff]  }
  0x21   :  { %845 = vmatprep.subr.bf16.mxu1 %v2419_v33  ;;  %v2458_v33 = vld [vmem:[%s3705_s1 + $0x190] ss:$8 sps:$4 sm:$0xff]   ;;  %121 = vst [vmem:[#allocation2 + $0x8] sm:$0xff] %v120_v32  ;;  %v2486_v26 = vld [vmem:[%s3705_s1 + $0x200] ss:$8 sps:$4 sm:$0xff]  }
  0x22   :  { %v2609_v56 = vld [vmem:[%s3707_s2 + $0x270] ss:$8 sps:$4 sm:$0xff]   ;;  %v2612_v17 = vld [vmem:[%s3707_s2 + $0x260] ss:$8 sps:$4 sm:$0xff]   ;;  %v2626_v6 = vld [vmem:[%s3707_s2 + $0x224] ss:$8 sps:$4 sm:$0xff]  }
  0x23   :  { %803 = vmatpush2.bf16.msra.mxu0 %v2421_v34  ;;  %v130_v34 = vsel %vm128_vm10, %v120_v32, 0  ;;  %v2495_v32 = vld [vmem:[%s3705_s1 + $0x2d0] ss:$8 sps:$4 sm:$0xff]  }
  0x24   :  { %846 = vmatpush2.bf16.msra.mxu1 %v2422_v35  ;;  %804 = vmatprep.subr.bf16.mxu0 %v2423_v36  ;;  %v131_v35 = vsel %vm129_vm11, %v109_v31, 0  ;;  %v2665_v36 = vmov 0  }
  0x25   :  { %847 = vmatprep.subr.bf16.mxu1 %v2425_v37  ;;  %v143_v37 = vsel %vm141_vm12, 65537, %v2665_v36  ;;  %vm161_vm12 = vcmask 1046532  }
  0x27   :  { %805 = vmatpush2.bf16.msra.mxu0 %v2427_v39  ;;  %v2459_v39 = vld [vmem:[%s3705_s1 + $0x84] ss:$8 sps:$4 sm:$0xff]  }
  0x28   :  { %848 = vmatpush2.bf16.msra.mxu1 %v2428_v40  ;;  %806 = vmatprep.subr.bf16.mxu0 %v2429_v41  ;;  %v123_v40 = vld [vmem:[#allocation2] sm:$0x11]  ;;  %v144_v41 = vsel %vm142_vm13, 65537, %v2665_v36  ;;  %vm3053_vm13 = vmor %vm160_vm2, %vm161_vm12  ;;  %v2501_v36 = vld [vmem:[%s3705_s1 + $0x2b0] ss:$8 sps:$4 sm:$0xff]  }
  0x29   :  { %849 = vmatprep.subr.bf16.mxu1 %v2431_v42  ;;  %v146_v42 = vrot.slane %v143_v37, 7  ;;  %v148_v47 = vrot.slane %v144_v41, 7  ;;  %v2506_v37 = vld [vmem:[%s3705_s1 + $0x2a4] ss:$8 sps:$4 sm:$0xff]   ;;  %v2507_v41 = vld [vmem:[%s3705_s1 + $0x290] ss:$8 sps:$4 sm:$0xff]  }
  0x2b   :  { %807 = vmatpush2.bf16.msra.mxu0 %v2433_v44  ;;  %v2148_v44 = vcombine.high %v130_v34, %v131_v35  ;;  %v3030_v60 = vrot.slane %v148_v47, 4  ;;  %vm3038_vm7 = vcmp.ne.s16.totalorder %v146_v42, 0 }
  0x2c   :  { %850 = vmatpush2.bf16.msra.mxu1 %v2434_v45  ;;  %808 = vmatprep.subr.bf16.mxu0 %v2435_v46  ;;  %v2461_v45 = vld [vmem:[%s3705_s1 + $0x184] ss:$8 sps:$4 sm:$0xff]   ;;  %v124_v46 = vsel %vm2874_vm6, %v110_v28, %v123_v40  ;;  %v2489_v28 = vld [vmem:[%s3705_s1 + $0x2f0] ss:$8 sps:$4 sm:$0xff]   ;;  %v2509_v40 = vld [vmem:[%s3705_s1 + $0x294] ss:$8 sps:$4 sm:$0xff]  }
  0x2d   :  { %851 = vmatprep.subr.bf16.mxu1 %v2437_v48  ;;  %v147_v48 = vrot.slane %v146_v42, 4  ;;  %818 = vmatprep.mubr.bf16.mxu0 %v2148_v44  ;;  %125 = vst [vmem:[#allocation2] sm:$0x11] %v124_v46  ;;  %vm3713_vm8 = vcmp.ne.s16.totalorder %v3030_v60, 0  ;;  %v2512_v42 = vld [vmem:[%s3705_s1 + $0x284] ss:$8 sps:$4 sm:$0xff]  }
  0x2e   :  { %v2510_v44 = vld [vmem:[%s3705_s1 + $0x280] ss:$8 sps:$4 sm:$0xff]  }
  0x2f   :  { %809 = vmatpush2.bf16.msra.mxu0 %v2439_v49  ;;  %v2463_v49 = vld [vmem:[%s3705_s1 + $0x80] ss:$8 sps:$4 sm:$0xff]   ;;  %v3017_v51 = vsel %vm145_vm14, %v147_v48, %v148_v47 }
  0x30   :  { %852 = vmatpush2.bf16.msra.mxu1 %v2440_v50  ;;  %810 = vmatprep.subr.bf16.mxu0 %v2441_v52  ;;  %v2464_v50 = vld [vmem:[%s3705_s1 + $0x180] ss:$8 sps:$4 sm:$0xff]   ;;  %v2467_v52 = vld [vmem:[%s3705_s1 + $0x274] ss:$8 sps:$4 sm:$0xff]   ;;  %vm3714_vm1 = vcmp.ne.s16.totalorder %v3017_v51, 0 }
  0x31   :  { %853 = vmatprep.subr.bf16.mxu1 %v2443_v53  ;;  %v2147_v53 = vcombine.low %v130_v34, %v131_v35  ;;  %v155_v59 = vsel %vm3714_vm1, %v109_v31, 0  ;;  %v2497_v31 = vld [vmem:[%s3705_s1 + $0x2d4] ss:$8 sps:$4 sm:$0xff]   ;;  %v2498_v34 = vld [vmem:[%s3705_s1 + $0x2c0] ss:$8 sps:$4 sm:$0xff]  }
  0x32   :  { %v165_v62 = vrot.slane %v155_v59, 5  ;;  %v2503_v35 = vld [vmem:[%s3705_s1 + $0x2b4] ss:$8 sps:$4 sm:$0xff]  }
  0x33   :  { %811 = vmatpush2.bf16.msra.mxu0 %v2445_v0  ;;  %v138_v0 = vld [vmem:[#allocation2 + $0x8] sm:$0xee] }
  0x34   :  { %854 = vmatpush2.bf16.msra.mxu1 %v2446_v4  ;;  %812 = vmatprep.subr.bf16.mxu0 %v2447_v7  ;;  %v140_v1 = vld [vmem:[#allocation2] sm:$0x11]  ;;  %v167_v2 = vrot.slane %v165_v62, 4  ;;  %v154_v4 = vsel %vm3038_vm7, %v138_v0, 0 }
  0x35   :  { %855 = vmatprep.subr.bf16.mxu1 %v2449_v12  ;;  %v156_v5 = vsel %vm3713_vm8, %v140_v1, 0  ;;  %v2476_v7 = vld [vmem:[%s3705_s1 + $0x244] ss:$8 sps:$4 sm:$0xff]   ;;  %v2146_v8 = vrot.slane %v154_v4, 9 }
  0x36   :  { %v168_v10 = vrot.slane %v156_v5, 5 }
  0x37   :  { %813 = vmatpush2.bf16.msra.mxu0 %v2451_v16  ;;  %v166_v11 = vsel %vm3053_vm13, %v2146_v8, %v165_v62 }
  0x38   :  { %856 = vmatpush2.bf16.msra.mxu1 %v2452_v20  ;;  %814 = vmatprep.subr.bf16.mxu0 %v2453_v24  ;;  %v169_v12 = vsel %vm3053_vm13, %v167_v2, %v168_v10  ;;  %v2477_v20 = vld [vmem:[%s3705_s1 + $0x230] ss:$8 sps:$4 sm:$0xff]  }
  0x39   :  { %857 = vmatprep.subr.bf16.mxu1 %v2455_v27  ;;  %v2152_v16 = vcombine.high %v166_v11, %v169_v12  ;;  %v2483_v24 = vld [vmem:[%s3705_s1 + $0x210] ss:$8 sps:$4 sm:$0xff]   ;;  %v2491_v27 = vld [vmem:[%s3705_s1 + $0x2f4] ss:$8 sps:$4 sm:$0xff]  }
  0x3b   :  { %815 = vmatpush2.bf16.msra.mxu0 %v2457_v30  ;;  %v2492_v30 = vld [vmem:[%s3705_s1 + $0x2e0] ss:$8 sps:$4 sm:$0xff]  }
  0x3c   :  { %858 = vmatpush2.bf16.msra.mxu1 %v2458_v33  ;;  %816 = vmatprep.subr.bf16.mxu0 %v2459_v39  ;;  %v2500_v33 = vld [vmem:[%s3705_s1 + $0x2c4] ss:$8 sps:$4 sm:$0xff]   ;;  %v2504_v39 = vld [vmem:[%s3705_s1 + $0x2a0] ss:$8 sps:$4 sm:$0xff]   ;;  %s2666_s1 = smov 4  }
  0x3d   :  { %859 = vmatprep.subr.bf16.mxu1 %v2461_v45  ;;  %v2151_v45 = vcombine.low %v166_v11, %v169_v12 }
  0x3f   :  { %817 = vmatpush2.bf16.msra.mxu0 %v2463_v49 }
  0x40   :  { %860 = vmatpush2.bf16.msra.mxu1 %v2464_v50  ;;  %872 = vmatprep.subr.bf16.mxu0 %v2467_v52 }
  0x42   :  { %819 = vmatmul.mubr.bf16.vlgmr.msra.gmra.mxu0 %v2147_v53 }
  0x43   :  { %862 = vmatmul.mubr.bf16.vlgmr.msra.gmra.mxu1 %v2358_v54  ;;  %873 = vmatpush1.bf16.msra.mxu0 %v2465_v57 }
  0x44   :  { %874 = vmatprep.subr.bf16.mxu0 %v2470_v61  ;;  %904 = vmatprep.mubr.bf16.mxu0 %v2152_v16 }
  0x47   :  { %875 = vmatpush1.bf16.msra.mxu0 %v2468_v55 }
  0x48   :  { %876 = vmatprep.subr.bf16.mxu0 %v2473_v63 }
  0x4b   :  { %877 = vmatpush1.bf16.msra.mxu0 %v2471_v3 }
  0x4c   :  { %878 = vmatprep.subr.bf16.mxu0 %v2476_v7 }
  0x4f   :  { %879 = vmatpush1.bf16.msra.mxu0 %v2474_v14 }
  0x50   :  { %880 = vmatprep.subr.bf16.mxu0 %v2479_v18 }
  0x53   :  { %881 = vmatpush1.bf16.msra.mxu0 %v2477_v20 }
  0x54   :  { %882 = vmatprep.subr.bf16.mxu0 %v2482_v21 }
  0x57   :  { %883 = vmatpush1.bf16.msra.mxu0 %v2480_v22 }
  0x58   :  { %884 = vmatprep.subr.bf16.mxu0 %v2485_v23 }
  0x5b   :  { %885 = vmatpush1.bf16.msra.mxu0 %v2483_v24 }
  0x5c   :  { %886 = vmatprep.subr.bf16.mxu0 %v2488_v25 }
  0x5f   :  { %887 = vmatpush1.bf16.msra.mxu0 %v2486_v26  ;;  %v3154_v26 = vand.u32 127, %v29_v38 }
  0x60   :  { %888 = vmatprep.subr.bf16.mxu0 %v2491_v27 }
  0x61   :  { %vm935_vm14 = vcmp.lt.s32.totalorder %v3154_v26, 4  ;;  %vm944_vm2 = vcmp.lt.s32.totalorder %v3154_v26, 8  ;;  %vm953_vm12 = vcmp.lt.s32.totalorder %v3154_v26, 16  ;;  %vm962_vm8 = vcmp.lt.s32.totalorder %v3154_v26, 32 }
  0x62   :  { %vm971_vm1 = vcmp.lt.s32.totalorder %v3154_v26, 64 }
  0x63   :  { %889 = vmatpush2.bf16.msra.mxu0 %v2489_v28 }
  0x64   :  { %890 = vmatprep.subr.bf16.mxu0 %v2494_v29 }
  0x67   :  { %891 = vmatpush2.bf16.msra.mxu0 %v2492_v30 }
  0x68   :  { %892 = vmatprep.subr.bf16.mxu0 %v2497_v31 }
  0x6b   :  { %893 = vmatpush2.bf16.msra.mxu0 %v2495_v32 }
  0x6c   :  { %894 = vmatprep.subr.bf16.mxu0 %v2500_v33 }
  0x6f   :  { %895 = vmatpush2.bf16.msra.mxu0 %v2498_v34 }
  0x70   :  { %896 = vmatprep.subr.bf16.mxu0 %v2503_v35 }
  0x73   :  { %897 = vmatpush2.bf16.msra.mxu0 %v2501_v36 }
  0x74   :  { %898 = vmatprep.subr.bf16.mxu0 %v2506_v37 }
  0x77   :  { %899 = vmatpush2.bf16.msra.mxu0 %v2504_v39 }
  0x78   :  { %900 = vmatprep.subr.bf16.mxu0 %v2509_v40 }
  0x7b   :  { %901 = vmatpush2.bf16.msra.mxu0 %v2507_v41 }
  0x7c   :  { %902 = vmatprep.subr.bf16.mxu0 %v2512_v42 }
  0x7f   :  { %903 = vmatpush2.bf16.msra.mxu0 %v2510_v44 }
  0x82   :  { %905 = vmatmul.mubr.bf16.vlgmr.msra.gmra.mxu0 %v2151_v45 }
 0x102   :  { %v820_v46 = vpop.f32.mrf.mxu0 }
 0x103   :  { %v863_v47 = vpop.f32.mrf.mxu1 }
 0x104   :  { %v822_v48 = vpop.f32.mrf.mxu0  ;;  %v864_v61 = vadd.f32 %v863_v47, %v820_v46 }
 0x105   :  { %v865_v49 = vpop.f32.mrf.mxu1 }
 0x106   :  { %v824_v50 = vpop.f32.mrf.mxu0  ;;  %v866_v63 = vadd.f32 %v865_v49, %v822_v48 }
 0x107   :  { %v867_v52 = vpop.f32.mrf.mxu1 }
 0x108   :  { %v826_v53 = vpop.f32.mrf.mxu0  ;;  %v868_v62 = vadd.f32 %v867_v52, %v824_v50 }
 0x109   :  { %v869_v57 = vpop.f32.mrf.mxu1 }
 0x10a   :  { %v870_v0 = vadd.f32 %v869_v57, %v826_v53 }
 0x142   :  { %v906_v54 = vpop.f32.mrf.mxu0 }
 0x143   :  { %v3139_v1 = vadd.f32 %v906_v54, %v864_v61 }
 0x144   :  { %v908_v59 = vpop.f32.mrf.mxu0 }
 0x145   :  { %v3143_v4 = vadd.f32 %v908_v59, %v866_v63 }
 0x146   :  { %v910_v55 = vpop.f32.mrf.mxu0 }
 0x147   :  { %v3141_v2 = vadd.f32 %v910_v55, %v868_v62  ;;  %v3190_v55 = vsub.s32 0, %v2839_v43 }
 0x148   :  { %v912_v3 = vpop.f32.mrf.mxu0 }
 0x149   :  { %v915_v5 = vadd.f32 %v3141_v2, %v3139_v1  ;;  %v3147_v7 = vadd.f32 %v912_v3, %v870_v0 }
 0x14b   :  { %v916_v8 = vrot.slane %v915_v5, 4  ;;  %v922_v10 = vadd.f32 %v3147_v7, %v3143_v4 }
 0x14d   :  { %v923_v11 = vrot.slane %v922_v10, 4  ;;  %v917_v12 = vadd.f32 %v916_v8, %v915_v5 }
 0x14f   :  { %v924_v14 = vadd.f32 %v923_v11, %v922_v10  ;;  %v918_v16 = vrot.slane %v917_v12, 2 }
 0x151   :  { %v919_v18 = vadd.f32 %v918_v16, %v917_v12  ;;  %v925_v20 = vrot.slane %v924_v14, 2 }
 0x153   :  { %v920_v21 = vrot.slane %v919_v18, 1  ;;  %v926_v22 = vadd.f32 %v925_v20, %v924_v14 }
 0x155   :  { %v921_v23 = vadd.f32 %v920_v21, %v919_v18  ;;  %v927_v24 = vrot.slane %v926_v22, 1 }
 0x157   :  { %929 = vrot.lane.b32.xlu0 %v921_v23, %s2666_s1  ;;  %v928_v25 = vadd.f32 %v927_v24, %v926_v22 }
 0x15b   :  { %931 = vrot.lane.b32.xlu0 %v928_v25, %s2666_s1 }
 0x1c9   :  { %v930_v27 = vpop.permute.xlu0 %929 }
 0x1cd   :  { %v932_v28 = vpop.permute.xlu0 %931 }
 0x1ce   :  { %v937_v29 = vsel %vm935_vm14, %v932_v28, %v930_v27  ;;  %v936_v31 = vsel %vm935_vm14, %v930_v27, %v932_v28 }
 0x1cf   :  { %v938_v30 = vadd.f32 %v937_v29, %v921_v23  ;;  %v939_v32 = vadd.f32 %v936_v31, %v928_v25 }
 0x1d1   :  { %940 = vrot.lane.b32.xlu1 %v938_v30, %s2667_s17 }
 0x1d5   :  { %942 = vrot.lane.b32.xlu1 %v939_v32, %s2667_s17 }
 0x243   :  { %v941_v33 = vpop.permute.xlu1 %940 }
 0x247   :  { %v943_v38 = vpop.permute.xlu1 %942 }
 0x248   :  { %v945_v34 = vsel %vm944_vm2, %v941_v33, %v943_v38  ;;  %v946_v35 = vsel %vm944_vm2, %v943_v38, %v941_v33 }
 0x249   :  { %v947_v36 = vadd.f32 %v946_v35, %v938_v30  ;;  %v948_v37 = vadd.f32 %v945_v34, %v939_v32 }
 0x24b   :  { %949 = vrot.lane.b32.xlu0 %v947_v36, %s2668_s18  ;;  %951 = vrot.lane.b32.xlu1 %v948_v37, %s2668_s18 }
 0x2bd   :  { %v950_v39 = vpop.permute.xlu0 %949  ;;  %v952_v40 = vpop.permute.xlu1 %951 }
 0x2be   :  { %v954_v41 = vsel %vm953_vm12, %v950_v39, %v952_v40  ;;  %v955_v42 = vsel %vm953_vm12, %v952_v40, %v950_v39 }
 0x2bf   :  { %v956_v44 = vadd.f32 %v955_v42, %v947_v36  ;;  %v957_v45 = vadd.f32 %v954_v41, %v948_v37 }
 0x2c1   :  { %958 = vrot.lane.b32.xlu0 %v956_v44, %s2669_s19  ;;  %960 = vrot.lane.b32.xlu1 %v957_v45, %s2669_s19 }
 0x333   :  { %v959_v46 = vpop.permute.xlu0 %958  ;;  %v961_v47 = vpop.permute.xlu1 %960 }
 0x334   :  { %v963_v48 = vsel %vm962_vm8, %v959_v46, %v961_v47  ;;  %v964_v49 = vsel %vm962_vm8, %v961_v47, %v959_v46 }
 0x335   :  { %v965_v50 = vadd.f32 %v964_v49, %v956_v44  ;;  %v966_v52 = vadd.f32 %v963_v48, %v957_v45  ;;  %v2513_v48 = vld [vmem:[%s3707_s2 + $0x170] ss:$8 sps:$4 sm:$0xff]   ;;  %v2515_v49 = vld [vmem:[%s3707_s2 + $0x174] ss:$8 sps:$4 sm:$0xff]  }
 0x336   :  { %1845 = vmatprep.subr.bf16.mxu0 %v2515_v49  ;;  %v2570_v49 = vld [vmem:[%s3707_s2] ss:$8 sps:$4 sm:$0xff]  }
 0x337   :  { %967 = vrot.lane.b32.xlu0 %v965_v50, %s2670_s20  ;;  %969 = vrot.lane.b32.xlu1 %v966_v52, %s2670_s20 }
 0x338   :  { %1846 = vmatpush1.bf16.msra.mxu0 %v2513_v48  ;;  %v2572_v48 = vld [vmem:[%s3707_s2 + $0x4] ss:$8 sps:$4 sm:$0xff]  }
 0x3a9   :  { %v968_v53 = vpop.permute.xlu0 %967  ;;  %v970_v54 = vpop.permute.xlu1 %969 }
 0x3aa   :  { %v972_v57 = vsel %vm971_vm1, %v968_v53, %v970_v54  ;;  %v973_v59 = vsel %vm971_vm1, %v970_v54, %v968_v53  ;;  %v2521_v53 = vld [vmem:[%s3707_s2 + $0x154] ss:$8 sps:$4 sm:$0xff]  }
 0x3ab   :  { %v974_v61 = vadd.f32 %v973_v59, %v965_v50  ;;  %v975_v62 = vadd.f32 %v972_v57, %v966_v52  ;;  %v2518_v50 = vld [vmem:[%s3707_s2 + $0x164] ss:$8 sps:$4 sm:$0xff]   ;;  %v2516_v52 = vld [vmem:[%s3707_s2 + $0x160] ss:$8 sps:$4 sm:$0xff]  }
 0x3ac   :  { %1847 = vmatprep.subr.bf16.mxu0 %v2518_v50  ;;  %v2563_v50 = vld [vmem:[%s3707_s2 + $0x1d4] ss:$8 sps:$4 sm:$0xff]  }
 0x3ad   :  { %v976_v63 = vadd.f32 %v975_v62, %v974_v61  ;;  %v2519_v62 = vld [vmem:[%s3707_s2 + $0x150] ss:$8 sps:$4 sm:$0xff]   ;;  %1848 = vmatpush1.bf16.msra.mxu0 %v2516_v52 }
 0x3ae   :  { %1849 = vmatprep.subr.bf16.mxu0 %v2521_v53  ;;  %v2561_v52 = vld [vmem:[%s3707_s2 + $0x1d0] ss:$8 sps:$4 sm:$0xff]   ;;  %v2569_v53 = vld [vmem:[%s3707_s2 + $0x1c4] ss:$8 sps:$4 sm:$0xff]  }
 0x3af   :  { %v3192_v0 = vmul.f32 0.0009765625, %v976_v63 }
 0x3b1   :  { %v981_v3 = vrot.slane %v3192_v0, %v3190_v55  ;;  %1850 = vmatpush1.bf16.msra.mxu0 %v2519_v62  ;;  %v2575_v62 = vld [vmem:[%s3707_s2 + $0x1b4] ss:$8 sps:$4 sm:$0xff]  }
 0x3b3   :  { %v983_v5 = vsub.f32 %v3143_v4, %v981_v3  ;;  %v985_v8 = vsub.f32 %v3147_v7, %v981_v3  ;;  %v982_v10 = vsub.f32 %v3139_v1, %v981_v3  ;;  %v984_v11 = vsub.f32 %v3141_v2, %v981_v3 }
 0x3b5   :  { %v987_v12 = vmul.f32 %v983_v5, %v983_v5  ;;  %v989_v14 = vmul.f32 %v985_v8, %v985_v8  ;;  %v986_v16 = vmul.f32 %v982_v10, %v982_v10  ;;  %v988_v18 = vmul.f32 %v984_v11, %v984_v11  ;;  %v2530_v5 = vld [vmem:[%s3707_s2 + $0x74] ss:$8 sps:$4 sm:$0xff]   ;;  %v2528_v8 = vld [vmem:[%s3707_s2 + $0x70] ss:$8 sps:$4 sm:$0xff]   ;;  %v2524_v10 = vld [vmem:[%s3707_s2 + $0x144] ss:$8 sps:$4 sm:$0xff]  }
 0x3b6   :  { %1802 = vmatprep.subr.bf16.mxu1 %v2530_v5  ;;  %v2522_v11 = vld [vmem:[%s3707_s2 + $0x140] ss:$8 sps:$4 sm:$0xff]   ;;  %1851 = vmatprep.subr.bf16.mxu0 %v2524_v10  ;;  %v2573_v5 = vld [vmem:[%s3707_s2 + $0x1b0] ss:$8 sps:$4 sm:$0xff]  }
 0x3b7   :  { %v997_v20 = vadd.f32 %v989_v14, %v987_v12  ;;  %v990_v21 = vadd.f32 %v988_v18, %v986_v16  ;;  %1803 = vmatpush1.bf16.msra.mxu1 %v2528_v8  ;;  %v2536_v12 = vld [vmem:[%s3707_s2 + $0x64] ss:$8 sps:$4 sm:$0xff]   ;;  %v2534_v14 = vld [vmem:[%s3707_s2 + $0x60] ss:$8 sps:$4 sm:$0xff]   ;;  %1852 = vmatpush1.bf16.msra.mxu0 %v2522_v11  ;;  %v2527_v16 = vld [vmem:[%s3707_s2 + $0x134] ss:$8 sps:$4 sm:$0xff]  }
 0x3b8   :  { %1804 = vmatprep.subr.bf16.mxu1 %v2536_v12  ;;  %v2525_v18 = vld [vmem:[%s3707_s2 + $0x130] ss:$8 sps:$4 sm:$0xff]   ;;  %1853 = vmatprep.subr.bf16.mxu0 %v2527_v16  ;;  %v2581_v8 = vld [vmem:[%s3707_s2 + $0x1a4] ss:$8 sps:$4 sm:$0xff]   ;;  %v2579_v12 = vld [vmem:[%s3707_s2 + $0x1a0] ss:$8 sps:$4 sm:$0xff]  }
 0x3b9   :  { %v998_v22 = vrot.slane %v997_v20, 4  ;;  %v991_v23 = vrot.slane %v990_v21, 4  ;;  %v2588_v10 = vld [vmem:[%s3707_s2 + $0xd0] ss:$8 sps:$4 sm:$0xff]   ;;  %v2596_v11 = vld [vmem:[%s3707_s2 + $0xc4] ss:$8 sps:$4 sm:$0xff]  }
 0x3ba   :  { %v2594_v16 = vld [vmem:[%s3707_s2 + $0xc0] ss:$8 sps:$4 sm:$0xff]  }
 0x3bb   :  { %v999_v24 = vadd.f32 %v998_v22, %v997_v20  ;;  %v992_v25 = vadd.f32 %v991_v23, %v990_v21  ;;  %1805 = vmatpush1.bf16.msra.mxu1 %v2534_v14  ;;  %v2542_v20 = vld [vmem:[%s3707_s2 + $0x54] ss:$8 sps:$4 sm:$0xff]   ;;  %v2540_v21 = vld [vmem:[%s3707_s2 + $0x50] ss:$8 sps:$4 sm:$0xff]   ;;  %1854 = vmatpush1.bf16.msra.mxu0 %v2525_v18  ;;  %v2533_v22 = vld [vmem:[%s3707_s2 + $0x124] ss:$8 sps:$4 sm:$0xff]  }
 0x3bc   :  { %1806 = vmatprep.subr.bf16.mxu1 %v2542_v20  ;;  %v2531_v23 = vld [vmem:[%s3707_s2 + $0x120] ss:$8 sps:$4 sm:$0xff]   ;;  %1855 = vmatprep.subr.bf16.mxu0 %v2533_v22  ;;  %v2587_v14 = vld [vmem:[%s3707_s2 + $0x194] ss:$8 sps:$4 sm:$0xff]   ;;  %v2585_v18 = vld [vmem:[%s3707_s2 + $0x190] ss:$8 sps:$4 sm:$0xff]  }
 0x3bd   :  { %v1000_v27 = vrot.slane %v999_v24, 2  ;;  %v993_v28 = vrot.slane %v992_v25, 2  ;;  %v2593_v20 = vld [vmem:[%s3707_s2 + $0x184] ss:$8 sps:$4 sm:$0xff]   ;;  %v2597_v22 = vld [vmem:[%s3707_s2 + $0xb0] ss:$8 sps:$4 sm:$0xff]  }
 0x3bf   :  { %v1001_v29 = vadd.f32 %v1000_v27, %v999_v24  ;;  %v994_v30 = vadd.f32 %v993_v28, %v992_v25  ;;  %1807 = vmatpush1.bf16.msra.mxu1 %v2540_v21  ;;  %v2548_v24 = vld [vmem:[%s3707_s2 + $0x44] ss:$8 sps:$4 sm:$0xff]   ;;  %v2546_v25 = vld [vmem:[%s3707_s2 + $0x40] ss:$8 sps:$4 sm:$0xff]   ;;  %1856 = vmatpush1.bf16.msra.mxu0 %v2531_v23  ;;  %v2599_v21 = vld [vmem:[%s3707_s2 + $0xb4] ss:$8 sps:$4 sm:$0xff]  }
 0x3c0   :  { %1808 = vmatprep.subr.bf16.mxu1 %v2548_v24  ;;  %v2591_v23 = vld [vmem:[%s3707_s2 + $0x180] ss:$8 sps:$4 sm:$0xff]   ;;  %v2602_v24 = vld [vmem:[%s3707_s2 + $0xa4] ss:$8 sps:$4 sm:$0xff]  }
 0x3c1   :  { %v1002_v31 = vrot.slane %v1001_v29, 1  ;;  %v995_v32 = vrot.slane %v994_v30, 1 }
 0x3c3   :  { %v1003_v33 = vadd.f32 %v1002_v31, %v1001_v29  ;;  %v996_v38 = vadd.f32 %v995_v32, %v994_v30  ;;  %v2539_v31 = vld [vmem:[%s3707_s2 + $0x114] ss:$8 sps:$4 sm:$0xff]   ;;  %1809 = vmatpush1.bf16.msra.mxu1 %v2546_v25  ;;  %v2600_v25 = vld [vmem:[%s3707_s2 + $0xa0] ss:$8 sps:$4 sm:$0xff]  }
 0x3c4   :  { %1857 = vmatprep.subr.bf16.mxu0 %v2539_v31  ;;  %v2611_v31 = vld [vmem:[%s3707_s2 + $0x274] ss:$8 sps:$4 sm:$0xff]  }
 0x3c5   :  { %1006 = vrot.lane.b32.xlu1 %v1003_v33, %s2666_s1  ;;  %1004 = vrot.lane.b32.xlu0 %v996_v38, %s2666_s1 }
 0x437   :  { %v1007_v34 = vpop.permute.xlu1 %1006  ;;  %v1005_v35 = vpop.permute.xlu0 %1004 }
 0x438   :  { %v1008_v36 = vsel %vm935_vm14, %v1005_v35, %v1007_v34  ;;  %v1009_v37 = vsel %vm935_vm14, %v1007_v34, %v1005_v35  ;;  %v2554_v34 = vld [vmem:[%s3707_s2 + $0x34] ss:$8 sps:$4 sm:$0xff]   ;;  %v2552_v35 = vld [vmem:[%s3707_s2 + $0x30] ss:$8 sps:$4 sm:$0xff]  }
 0x439   :  { %v1010_v39 = vadd.f32 %v1009_v37, %v996_v38  ;;  %v1011_v40 = vadd.f32 %v1008_v36, %v1003_v33  ;;  %v2537_v38 = vld [vmem:[%s3707_s2 + $0x110] ss:$8 sps:$4 sm:$0xff]   ;;  %v2545_v36 = vld [vmem:[%s3707_s2 + $0x104] ss:$8 sps:$4 sm:$0xff]   ;;  %1810 = vmatprep.subr.bf16.mxu1 %v2554_v34  ;;  %v2543_v37 = vld [vmem:[%s3707_s2 + $0x100] ss:$8 sps:$4 sm:$0xff]  }
 0x43a   :  { %1858 = vmatpush1.bf16.msra.mxu0 %v2537_v38  ;;  %1811 = vmatpush1.bf16.msra.mxu1 %v2552_v35 }
 0x43b   :  { %1012 = vrot.lane.b32.xlu0 %v1010_v39, %s2667_s17  ;;  %1014 = vrot.lane.b32.xlu1 %v1011_v40, %s2667_s17 }
 0x43c   :  { %1859 = vmatprep.subr.bf16.mxu0 %v2545_v36 }
 0x43e   :  { %1860 = vmatpush1.bf16.msra.mxu0 %v2543_v37 }
 0x4ad   :  { %v1013_v41 = vpop.permute.xlu0 %1012  ;;  %v1015_v42 = vpop.permute.xlu1 %1014 }
 0x4ae   :  { %v1016_v44 = vsel %vm944_vm2, %v1013_v41, %v1015_v42  ;;  %v1017_v45 = vsel %vm944_vm2, %v1015_v42, %v1013_v41  ;;  %v2551_v41 = vld [vmem:[%s3707_s2 + $0x1f4] ss:$8 sps:$4 sm:$0xff]   ;;  %v2549_v42 = vld [vmem:[%s3707_s2 + $0x1f0] ss:$8 sps:$4 sm:$0xff]  }
 0x4af   :  { %v1018_v46 = vadd.f32 %v1017_v45, %v1010_v39  ;;  %v1019_v47 = vadd.f32 %v1016_v44, %v1011_v40  ;;  %v2560_v39 = vld [vmem:[%s3707_s2 + $0x24] ss:$8 sps:$4 sm:$0xff]   ;;  %v2558_v40 = vld [vmem:[%s3707_s2 + $0x20] ss:$8 sps:$4 sm:$0xff]   ;;  %v2566_v44 = vld [vmem:[%s3707_s2 + $0x14] ss:$8 sps:$4 sm:$0xff]   ;;  %1861 = vmatprep.subr.bf16.mxu0 %v2551_v41 }
 0x4b0   :  { %1812 = vmatprep.subr.bf16.mxu1 %v2560_v39  ;;  %v2564_v45 = vld [vmem:[%s3707_s2 + $0x10] ss:$8 sps:$4 sm:$0xff]   ;;  %1862 = vmatpush2.bf16.msra.mxu0 %v2549_v42 }
 0x4b1   :  { %1020 = vrot.lane.b32.xlu0 %v1018_v46, %s2668_s18  ;;  %1022 = vrot.lane.b32.xlu1 %v1019_v47, %s2668_s18 }
 0x4b2   :  { %1813 = vmatpush1.bf16.msra.mxu1 %v2558_v40 }
 0x4b3   :  { %1814 = vmatprep.subr.bf16.mxu1 %v2566_v44  ;;  %v2671_v44 = vmov 1966171168  }
 0x4b6   :  { %1815 = vmatpush1.bf16.msra.mxu1 %v2564_v45  ;;  %v1052_v45 = vunpack.c.l.s4 %v2671_v44 }
 0x4b7   :  { %1816 = vmatprep.subr.bf16.mxu1 %v2572_v48 }
 0x4ba   :  { %1817 = vmatpush1.bf16.msra.mxu1 %v2570_v49 }
 0x523   :  { %v1021_v54 = vpop.permute.xlu0 %1020  ;;  %v1023_v57 = vpop.permute.xlu1 %1022 }
 0x524   :  { %v1024_v59 = vsel %vm953_vm12, %v1021_v54, %v1023_v57  ;;  %v1025_v61 = vsel %vm953_vm12, %v1023_v57, %v1021_v54  ;;  %v2576_v54 = vld [vmem:[%s3707_s2 + $0xf0] ss:$8 sps:$4 sm:$0xff]   ;;  %v2578_v57 = vld [vmem:[%s3707_s2 + $0xf4] ss:$8 sps:$4 sm:$0xff]  }
 0x525   :  { %v1026_v63 = vadd.f32 %v1025_v61, %v1018_v46  ;;  %v1027_v3 = vadd.f32 %v1024_v59, %v1019_v47  ;;  %v2557_v46 = vld [vmem:[%s3707_s2 + $0x1e4] ss:$8 sps:$4 sm:$0xff]   ;;  %v2555_v47 = vld [vmem:[%s3707_s2 + $0x1e0] ss:$8 sps:$4 sm:$0xff]   ;;  %1818 = vmatprep.subr.bf16.mxu1 %v2578_v57 }
 0x526   :  { %1863 = vmatprep.subr.bf16.mxu0 %v2557_v46  ;;  %v2567_v59 = vld [vmem:[%s3707_s2 + $0x1c0] ss:$8 sps:$4 sm:$0xff]   ;;  %v2584_v61 = vld [vmem:[%s3707_s2 + $0xe4] ss:$8 sps:$4 sm:$0xff]   ;;  %1819 = vmatpush2.bf16.msra.mxu1 %v2576_v54  ;;  %v1053_v46 = vunpack.c.0.s8 %v1052_v45 }
 0x527   :  { %1028 = vrot.lane.b32.xlu0 %v1026_v63, %s2669_s19  ;;  %1030 = vrot.lane.b32.xlu1 %v1027_v3, %s2669_s19 }
 0x528   :  { %1864 = vmatpush2.bf16.msra.mxu0 %v2555_v47  ;;  %1820 = vmatprep.subr.bf16.mxu1 %v2584_v61  ;;  %v3434_v47 = vsub.s32 %v1053_v46, %v2839_v43  ;;  %v2614_v46 = vld [vmem:[%s3707_s2 + $0x264] ss:$8 sps:$4 sm:$0xff]  }
 0x529   :  { %1865 = vmatprep.subr.bf16.mxu0 %v2563_v50 }
 0x52c   :  { %1866 = vmatpush2.bf16.msra.mxu0 %v2561_v52  ;;  %v3442_v52 = vsub.s32 1, %v2839_v43 }
 0x52d   :  { %1867 = vmatprep.subr.bf16.mxu0 %v2569_v53 }
 0x530   :  { %1868 = vmatpush2.bf16.msra.mxu0 %v2567_v59 }
 0x531   :  { %1869 = vmatprep.subr.bf16.mxu0 %v2575_v62 }
 0x534   :  { %1870 = vmatpush2.bf16.msra.mxu0 %v2573_v5 }
 0x535   :  { %1871 = vmatprep.subr.bf16.mxu0 %v2581_v8 }
 0x538   :  { %1872 = vmatpush2.bf16.msra.mxu0 %v2579_v12 }
 0x539   :  { %1873 = vmatprep.subr.bf16.mxu0 %v2587_v14 }
 0x53c   :  { %1874 = vmatpush2.bf16.msra.mxu0 %v2585_v18 }
 0x53d   :  { %1875 = vmatprep.subr.bf16.mxu0 %v2593_v20 }
 0x540   :  { %1876 = vmatpush2.bf16.msra.mxu0 %v2591_v23 }
 0x599   :  { %v1029_v27 = vpop.permute.xlu0 %1028  ;;  %v1031_v28 = vpop.permute.xlu1 %1030 }
 0x59a   :  { %v1032_v29 = vsel %vm962_vm8, %v1029_v27, %v1031_v28  ;;  %v1033_v30 = vsel %vm962_vm8, %v1031_v28, %v1029_v27  ;;  %v2605_v27 = vld [vmem:[%s3707_s2 + $0x94] ss:$8 sps:$4 sm:$0xff]   ;;  %v2603_v28 = vld [vmem:[%s3707_s2 + $0x90] ss:$8 sps:$4 sm:$0xff]  }
 0x59b   :  { %v3287_v32 = vadd.f32 %v1033_v30, %v1026_v63  ;;  %v3289_v33 = vadd.f32 %v1032_v29, %v1027_v3  ;;  %v2582_v63 = vld [vmem:[%s3707_s2 + $0xe0] ss:$8 sps:$4 sm:$0xff]   ;;  %v2590_v3 = vld [vmem:[%s3707_s2 + $0xd4] ss:$8 sps:$4 sm:$0xff]   ;;  %v2608_v29 = vld [vmem:[%s3707_s2 + $0x84] ss:$8 sps:$4 sm:$0xff]  }
 0x59c   :  { %1821 = vmatpush2.bf16.msra.mxu1 %v2582_v63  ;;  %v2606_v30 = vld [vmem:[%s3707_s2 + $0x80] ss:$8 sps:$4 sm:$0xff]  }
 0x59d   :  { %1036 = vrot.lane.b32.xlu0 %v3287_v32, %s2670_s20  ;;  %1038 = vrot.lane.b32.xlu1 %v3289_v33, %s2670_s20 }
 0x59e   :  { %1822 = vmatprep.subr.bf16.mxu1 %v2590_v3  ;;  %v1067_v3 = vld [vmem:[%s3709_s4] sm:$0x3] }
 0x5a0   :  { %1823 = vmatpush2.bf16.msra.mxu1 %v2588_v10 }
 0x5a1   :  { %1824 = vmatprep.subr.bf16.mxu1 %v2596_v11 }
 0x5a4   :  { %1825 = vmatpush2.bf16.msra.mxu1 %v2594_v16 }
 0x5a5   :  { %1826 = vmatprep.subr.bf16.mxu1 %v2599_v21 }
 0x5a8   :  { %1827 = vmatpush2.bf16.msra.mxu1 %v2597_v22 }
 0x5a9   :  { %1828 = vmatprep.subr.bf16.mxu1 %v2602_v24 }
 0x5ac   :  { %1829 = vmatpush2.bf16.msra.mxu1 %v2600_v25 }
 0x5ad   :  { %1830 = vmatprep.subr.bf16.mxu1 %v2605_v27 }
 0x5b0   :  { %1831 = vmatpush2.bf16.msra.mxu1 %v2603_v28 }
 0x5b1   :  { %1832 = vmatprep.subr.bf16.mxu1 %v2608_v29 }
 0x5b4   :  { %1833 = vmatpush2.bf16.msra.mxu1 %v2606_v30 }
 0x5b5   :  { %1888 = vmatprep.subr.bf16.mxu1 %v2611_v31 }
 0x60f   :  { %v1037_v38 = vpop.permute.xlu0 %1036  ;;  %v1039_v34 = vpop.permute.xlu1 %1038 }
 0x610   :  { %v1040_v35 = vsel %vm971_vm1, %v1037_v38, %v1039_v34  ;;  %v1041_v36 = vsel %vm971_vm1, %v1039_v34, %v1037_v38  ;;  %v1153_v34 = vld [vmem:[#allocation2 + $0x8] sm:$0xff] }
 0x611   :  { %v1042_v37 = vadd.f32 %v1041_v36, %v3287_v32  ;;  %v1043_v39 = vadd.f32 %v1040_v35, %v3289_v33  ;;  %v1046_v32 = vld [vmem:[%s3708_s3] sm:$0x3] }
 0x612   :  { %v1157_v35 = vld [vmem:[#allocation2] sm:$0x11] }
 0x613   :  { %v1044_v40 = vadd.f32 %v1043_v39, %v1042_v37 }
 0x615   :  { %v1045_v41 = vmul.f32 0.0009765625, %v1044_v40 }
 0x617   :  { %v1047_v42 = vadd.f32 1e-05, %v1045_v41 }
 0x619   :  { %2657 = vrsqrt.f32 %v1047_v42 }
 0x626   :  { %v2658_v48 = vpop.eup %2657 }
 0x627   :  { %v1050_v49 = vcombine.low %v2658_v48, %v2658_v48 }
 0x629   :  { %v1057_v50 = vrot.slane %v1050_v49, %v3434_v47  ;;  %v2617_v49 = vld [vmem:[%s3707_s2 + $0x254] ss:$8 sps:$4 sm:$0xff]  }
 0x62b   :  { %v1064_v33 = vrot.slane %v1057_v50, %v3434_v47 }
 0x62d   :  { %v1066_v53 = vmul.f32 %v1064_v33, %v1046_v32 }
 0x62f   :  { %v1072_v54 = vrot.slane %v1066_v53, %v3190_v55  ;;  %v1076_v57 = vrot.slane %v1066_v53, %v3442_v52 }
 0x631   :  { %v1079_v59 = vmul.f32 %v1072_v54, %v3192_v0  ;;  %v1080_v61 = vmul.f32 %v1076_v57, %v3192_v0  ;;  %v1100_v8 = vmul.f32 %v1072_v54, %v3139_v1  ;;  %v1101_v10 = vmul.f32 %v1076_v57, %v3143_v4 }
 0x632   :  { %v1102_v11 = vmul.f32 %v1072_v54, %v3141_v2  ;;  %v1103_v12 = vmul.f32 %v1076_v57, %v3147_v7 }
 0x633   :  { %v1083_v62 = vcombine.low %v1079_v59, %v1080_v61  ;;  %v2615_v59 = vld [vmem:[%s3707_s2 + $0x250] ss:$8 sps:$4 sm:$0xff]   ;;  %v2620_v61 = vld [vmem:[%s3707_s2 + $0x244] ss:$8 sps:$4 sm:$0xff]  }
 0x635   :  { %v1090_v63 = vrot.slane %v1083_v62, %v3434_v47 }
 0x637   :  { %v1097_v5 = vrot.slane %v1090_v63, %v3434_v47  ;;  %v2618_v63 = vld [vmem:[%s3707_s2 + $0x240] ss:$8 sps:$4 sm:$0xff]  }
 0x639   :  { %v1099_v43 = vsub.f32 %v1067_v3, %v1097_v5  ;;  %v2623_v3 = vld [vmem:[%s3707_s2 + $0x234] ss:$8 sps:$4 sm:$0xff]   ;;  %v2621_v5 = vld [vmem:[%s3707_s2 + $0x230] ss:$8 sps:$4 sm:$0xff]  }
 0x63b   :  { %v1108_v0 = vrot.slane %v1099_v43, %v3190_v55  ;;  %v1112_v14 = vrot.slane %v1099_v43, %v3442_v52  ;;  %v2624_v43 = vld [vmem:[%s3707_s2 + $0x220] ss:$8 sps:$4 sm:$0xff]  }
 0x63d   :  { %v1115_v16 = vadd.f32 %v1108_v0, %v1100_v8  ;;  %v1116_v18 = vadd.f32 %v1112_v14, %v1101_v10  ;;  %v1117_v20 = vadd.f32 %v1108_v0, %v1102_v11  ;;  %v1118_v21 = vadd.f32 %v1112_v14, %v1103_v12  ;;  %v2629_v8 = vld [vmem:[%s3707_s2 + $0x214] ss:$8 sps:$4 sm:$0xff]   ;;  %v2627_v10 = vld [vmem:[%s3707_s2 + $0x210] ss:$8 sps:$4 sm:$0xff]   ;;  %v2632_v11 = vld [vmem:[%s3707_s2 + $0x204] ss:$8 sps:$4 sm:$0xff]  }
 0x63e   :  { %v2630_v12 = vld [vmem:[%s3707_s2 + $0x200] ss:$8 sps:$4 sm:$0xff]   ;;  %v2635_v0 = vld [vmem:[%s3707_s2 + $0x2f4] ss:$8 sps:$4 sm:$0xff]   ;;  %v2633_v14 = vld [vmem:[%s3707_s2 + $0x2f0] ss:$8 sps:$4 sm:$0xff]  }
 0x63f   :  { %v1119_v22 = vmax.f32 %v1115_v16, 0.0  ;;  %v1120_v23 = vmax.f32 %v1116_v18, 0.0  ;;  %v1121_v24 = vmax.f32 %v1117_v20, 0.0  ;;  %v1122_v25 = vmax.f32 %v1118_v21, 0.0  ;;  %v2638_v16 = vld [vmem:[%s3707_s2 + $0x2e4] ss:$8 sps:$4 sm:$0xff]  }
 0x640   :  { %v2636_v18 = vld [vmem:[%s3707_s2 + $0x2e0] ss:$8 sps:$4 sm:$0xff]   ;;  %v2641_v20 = vld [vmem:[%s3707_s2 + $0x2d4] ss:$8 sps:$4 sm:$0xff]   ;;  %v2639_v21 = vld [vmem:[%s3707_s2 + $0x2d0] ss:$8 sps:$4 sm:$0xff]  }
 0x641   :  { %v2356_v27 = vpack.c.bf16 %v1120_v23, %v1119_v22  ;;  %v2357_v1 = vpack.c.bf16 %v1122_v25, %v1121_v24  ;;  %v2361_v28 = vpack.c.bf16 %v1122_v25, %v1120_v23  ;;  %v2360_v4 = vpack.c.bf16 %v1121_v24, %v1119_v22  ;;  %v2644_v22 = vld [vmem:[%s3707_s2 + $0x2c4] ss:$8 sps:$4 sm:$0xff]   ;;  %v2642_v23 = vld [vmem:[%s3707_s2 + $0x2c0] ss:$8 sps:$4 sm:$0xff]   ;;  %v2647_v24 = vld [vmem:[%s3707_s2 + $0x2b4] ss:$8 sps:$4 sm:$0xff]  }
 0x642   :  { %v2645_v25 = vld [vmem:[%s3707_s2 + $0x2b0] ss:$8 sps:$4 sm:$0xff]  }
 0x643   :  { %v1134_v29 = vshrl.u32 %v2356_v27, 16  ;;  %v1142_v2 = vshrl.u32 %v2357_v1, 16  ;;  %1877 = vmatprep.mubr.bf16.mxu0 %v2361_v28  ;;  %v1137_v30 = vshll.u32 %v2356_v27, 16  ;;  %v1145_v38 = vshll.u32 %v2357_v1, 16  ;;  %v2650_v27 = vld [vmem:[%s3707_s2 + $0x2a4] ss:$8 sps:$4 sm:$0xff]  }
 0x644   :  { %1878 = vmatmul.mubr.bf16.vlgmr.msra.gmra.mxu0 %v2360_v4  ;;  %v2648_v1 = vld [vmem:[%s3707_s2 + $0x2a0] ss:$8 sps:$4 sm:$0xff]   ;;  %v2653_v28 = vld [vmem:[%s3707_s2 + $0x294] ss:$8 sps:$4 sm:$0xff]   ;;  %v2651_v4 = vld [vmem:[%s3707_s2 + $0x290] ss:$8 sps:$4 sm:$0xff]  }
 0x645   :  { %v1136_v7 = vrot.slane %v1134_v29, 7  ;;  %v1144_v31 = vrot.slane %v1142_v2, 7  ;;  %v2656_v29 = vld [vmem:[%s3707_s2 + $0x284] ss:$8 sps:$4 sm:$0xff]   ;;  %v2654_v2 = vld [vmem:[%s3707_s2 + $0x280] ss:$8 sps:$4 sm:$0xff]  }
 0x647   :  { %v1139_v36 = vor.u32 %v1137_v30, %v1136_v7  ;;  %v1140_v37 = vrot.slane %v1136_v7, 4  ;;  %v1147_v39 = vor.u32 %v1145_v38, %v1144_v31  ;;  %v1149_v40 = vrot.slane %v1144_v31, 4 }
 0x649   :  { %v1148_v41 = vsel %vm2915_vm15, %v1140_v37, %v1147_v39  ;;  %v1154_v42 = vsel %vm118_vm9, %v1139_v36, %v1153_v34  ;;  %v1158_v44 = vsel %vm2874_vm6, %v1149_v40, %v1157_v35  ;;  %vm3737_vm6 = vcmp.ne.s16.totalorder %v3017_v51, 0 }
 0x64a   :  { %1155 = vst [vmem:[#allocation2 + $0x8] sm:$0xff] %v1154_v42  ;;  %1159 = vst [vmem:[#allocation2] sm:$0x11] %v1158_v44  ;;  %v1162_v45 = vsel %vm128_vm10, %v1154_v42, 0  ;;  %v1163_v9 = vsel %vm129_vm11, %v1148_v41, 0  ;;  %v1174_v13 = vsel %vm3737_vm6, %v1148_v41, 0 }
 0x64b   :  { %v2252_v15 = vcombine.low %v1162_v45, %v1163_v9  ;;  %v2253_v19 = vcombine.high %v1162_v45, %v1163_v9  ;;  %v1181_v48 = vrot.slane %v1174_v13, 5  ;;  %vm3738_vm15 = vcmp.ne.s16.totalorder %v3030_v60, 0 }
 0x64d   :  { %1834 = vmatprep.mubr.bf16.mxu1 %v2253_v19  ;;  %v1183_v54 = vrot.slane %v1181_v48, 4 }
 0x64e   :  { %1835 = vmatmul.mubr.bf16.vlgmr.msra.gmra.mxu1 %v2252_v15 }
 0x64f   :  { %1889 = vmatpush1.bf16.msra.mxu1 %v2609_v56 }
 0x650   :  { %1890 = vmatprep.subr.bf16.mxu1 %v2614_v46 }
 0x651   :  { %v1170_v50 = vld [vmem:[#allocation2 + $0x8] sm:$0xee]  ;;  %v1172_v32 = vld [vmem:[#allocation2] sm:$0x11] }
 0x652   :  { %v1173_v33 = vsel %vm3038_vm7, %v1170_v50, 0  ;;  %v1175_v51 = vsel %vm3738_vm15, %v1172_v32, 0 }
 0x653   :  { %1891 = vmatpush1.bf16.msra.mxu1 %v2612_v17  ;;  %v2251_v53 = vrot.slane %v1173_v33, 9  ;;  %v1184_v57 = vrot.slane %v1175_v51, 5 }
 0x654   :  { %1892 = vmatprep.subr.bf16.mxu1 %v2617_v49 }
 0x655   :  { %v1182_v58 = vsel %vm3053_vm13, %v2251_v53, %v1181_v48  ;;  %v1185_v60 = vsel %vm3053_vm13, %v1183_v54, %v1184_v57 }
 0x656   :  { %v2257_v62 = vcombine.high %v1182_v58, %v1185_v60  ;;  %v2256_v7 = vcombine.low %v1182_v58, %v1185_v60 }
 0x657   :  { %1893 = vmatpush1.bf16.msra.mxu1 %v2615_v59 }
 0x658   :  { %1920 = vmatprep.mubr.bf16.mxu1 %v2257_v62  ;;  %1894 = vmatprep.subr.bf16.mxu1 %v2620_v61 }
 0x65b   :  { %1895 = vmatpush1.bf16.msra.mxu1 %v2618_v63 }
 0x65c   :  { %1896 = vmatprep.subr.bf16.mxu1 %v2623_v3 }
 0x65f   :  { %1897 = vmatpush1.bf16.msra.mxu1 %v2621_v5 }
 0x660   :  { %1898 = vmatprep.subr.bf16.mxu1 %v2626_v6 }
 0x663   :  { %1899 = vmatpush1.bf16.msra.mxu1 %v2624_v43 }
 0x664   :  { %1900 = vmatprep.subr.bf16.mxu1 %v2629_v8 }
 0x667   :  { %1901 = vmatpush1.bf16.msra.mxu1 %v2627_v10 }
 0x668   :  { %1902 = vmatprep.subr.bf16.mxu1 %v2632_v11 }
 0x66b   :  { %1903 = vmatpush1.bf16.msra.mxu1 %v2630_v12 }
 0x66c   :  { %1904 = vmatprep.subr.bf16.mxu1 %v2635_v0 }
 0x66f   :  { %1905 = vmatpush2.bf16.msra.mxu1 %v2633_v14 }
 0x670   :  { %1906 = vmatprep.subr.bf16.mxu1 %v2638_v16 }
 0x673   :  { %1907 = vmatpush2.bf16.msra.mxu1 %v2636_v18 }
 0x674   :  { %1908 = vmatprep.subr.bf16.mxu1 %v2641_v20 }
 0x677   :  { %1909 = vmatpush2.bf16.msra.mxu1 %v2639_v21 }
 0x678   :  { %1910 = vmatprep.subr.bf16.mxu1 %v2644_v22 }
 0x67b   :  { %1911 = vmatpush2.bf16.msra.mxu1 %v2642_v23 }
 0x67c   :  { %1912 = vmatprep.subr.bf16.mxu1 %v2647_v24 }
 0x67f   :  { %1913 = vmatpush2.bf16.msra.mxu1 %v2645_v25 }
 0x680   :  { %1914 = vmatprep.subr.bf16.mxu1 %v2650_v27 }
 0x683   :  { %1915 = vmatpush2.bf16.msra.mxu1 %v2648_v1 }
 0x684   :  { %1916 = vmatprep.subr.bf16.mxu1 %v2653_v28 }
 0x687   :  { %1917 = vmatpush2.bf16.msra.mxu1 %v2651_v4 }
 0x688   :  { %1918 = vmatprep.subr.bf16.mxu1 %v2656_v29 }
 0x68b   :  { %1919 = vmatpush2.bf16.msra.mxu1 %v2654_v2 }
 0x68e   :  { %1921 = vmatmul.mubr.bf16.vlgmr.msra.gmra.mxu1 %v2256_v7 }
 0x704   :  { %v1879_v38 = vpop.f32.mrf.mxu0 }
 0x706   :  { %v1881_v35 = vpop.f32.mrf.mxu0 }
 0x708   :  { %v1883_v37 = vpop.f32.mrf.mxu0 }
 0x70a   :  { %v1885_v44 = vpop.f32.mrf.mxu0 }
 0x70e   :  { %v1836_v30 = vpop.f32.mrf.mxu1 }
 0x70f   :  { %v1880_v41 = vadd.f32 %v1879_v38, %v1836_v30 }
 0x710   :  { %v1838_v31 = vpop.f32.mrf.mxu1 }
 0x711   :  { %v1882_v9 = vadd.f32 %v1881_v35, %v1838_v31 }
 0x712   :  { %v1840_v34 = vpop.f32.mrf.mxu1 }
 0x713   :  { %v1884_v42 = vadd.f32 %v1883_v37, %v1840_v34 }
 0x714   :  { %v1842_v36 = vpop.f32.mrf.mxu1 }
 0x715   :  { %v1886_v15 = vadd.f32 %v1885_v44, %v1842_v36 }
 0x74e   :  { %v1922_v39 = vpop.f32.mrf.mxu1 }
 0x74f   :  { %v3581_v19 = vadd.f32 %v1922_v39, %v1880_v41 }
 0x750   :  { %v1924_v40 = vpop.f32.mrf.mxu1 }
 0x751   :  { %v3585_v13 = vadd.f32 %v1924_v40, %v1882_v9 }
 0x752   :  { %v1926_v45 = vpop.f32.mrf.mxu1 }
 0x753   :  { %v3583_v56 = vadd.f32 %v1926_v45, %v1884_v42 }
 0x754   :  { %v1928_v46 = vpop.f32.mrf.mxu1 }
 0x755   :  { %v1931_v17 = vadd.f32 %v3583_v56, %v3581_v19  ;;  %v3589_v48 = vadd.f32 %v1928_v46, %v1886_v15 }
 0x757   :  { %v1932_v49 = vrot.slane %v1931_v17, 4  ;;  %v1938_v50 = vadd.f32 %v3589_v48, %v3585_v13 }
 0x759   :  { %v1933_v32 = vadd.f32 %v1932_v49, %v1931_v17  ;;  %v1939_v33 = vrot.slane %v1938_v50, 4 }
 0x75b   :  { %v1940_v51 = vadd.f32 %v1939_v33, %v1938_v50  ;;  %v1934_v53 = vrot.slane %v1933_v32, 2 }
 0x75d   :  { %v1935_v54 = vadd.f32 %v1934_v53, %v1933_v32  ;;  %v1941_v57 = vrot.slane %v1940_v51, 2 }
 0x75f   :  { %v1936_v59 = vrot.slane %v1935_v54, 1  ;;  %v1942_v61 = vadd.f32 %v1941_v57, %v1940_v51 }
 0x761   :  { %v1937_v58 = vadd.f32 %v1936_v59, %v1935_v54  ;;  %v1943_v60 = vrot.slane %v1942_v61, 1 }
 0x763   :  { %1945 = vrot.lane.b32.xlu0 %v1937_v58, %s2666_s1  ;;  %v1944_v62 = vadd.f32 %v1943_v60, %v1942_v61 }
 0x765   :  { %1947 = vrot.lane.b32.xlu1 %v1944_v62, %s2666_s1 }
 0x7d5   :  { %v1946_v63 = vpop.permute.xlu0 %1945 }
 0x7d7   :  { %v1948_v3 = vpop.permute.xlu1 %1947 }
 0x7d8   :  { %v1949_v5 = vsel %vm935_vm14, %v1946_v63, %v1948_v3  ;;  %v1950_v6 = vsel %vm935_vm14, %v1948_v3, %v1946_v63 }
 0x7d9   :  { %v1951_v43 = vadd.f32 %v1950_v6, %v1937_v58  ;;  %v1952_v8 = vadd.f32 %v1949_v5, %v1944_v62 }
 0x7db   :  { %1953 = vrot.lane.b32.xlu0 %v1951_v43, %s2667_s17  ;;  %1955 = vrot.lane.b32.xlu1 %v1952_v8, %s2667_s17 }
 0x84d   :  { %v1954_v10 = vpop.permute.xlu0 %1953  ;;  %v1956_v11 = vpop.permute.xlu1 %1955 }
 0x84e   :  { %v1957_v12 = vsel %vm944_vm2, %v1954_v10, %v1956_v11  ;;  %v1958_v0 = vsel %vm944_vm2, %v1956_v11, %v1954_v10 }
 0x84f   :  { %v1959_v14 = vadd.f32 %v1958_v0, %v1951_v43  ;;  %v1960_v16 = vadd.f32 %v1957_v12, %v1952_v8 }
 0x851   :  { %1961 = vrot.lane.b32.xlu0 %v1959_v14, %s2668_s18  ;;  %1963 = vrot.lane.b32.xlu1 %v1960_v16, %s2668_s18 }
 0x8c3   :  { %v1962_v18 = vpop.permute.xlu0 %1961  ;;  %v1964_v20 = vpop.permute.xlu1 %1963 }
 0x8c4   :  { %v1965_v21 = vsel %vm953_vm12, %v1962_v18, %v1964_v20  ;;  %v1966_v22 = vsel %vm953_vm12, %v1964_v20, %v1962_v18 }
 0x8c5   :  { %v1967_v23 = vadd.f32 %v1966_v22, %v1959_v14  ;;  %v1968_v24 = vadd.f32 %v1965_v21, %v1960_v16 }
 0x8c7   :  { %1969 = vrot.lane.b32.xlu0 %v1967_v23, %s2669_s19  ;;  %1971 = vrot.lane.b32.xlu1 %v1968_v24, %s2669_s19 }
 0x939   :  { %v1970_v25 = vpop.permute.xlu0 %1969  ;;  %v1972_v27 = vpop.permute.xlu1 %1971 }
 0x93a   :  { %v1973_v1 = vsel %vm962_vm8, %v1970_v25, %v1972_v27  ;;  %v1974_v28 = vsel %vm962_vm8, %v1972_v27, %v1970_v25 }
 0x93b   :  { %v1975_v4 = vadd.f32 %v1974_v28, %v1967_v23  ;;  %v1976_v29 = vadd.f32 %v1973_v1, %v1968_v24 }
 0x93d   :  { %1977 = vrot.lane.b32.xlu0 %v1975_v4, %s2670_s20  ;;  %1979 = vrot.lane.b32.xlu1 %v1976_v29, %s2670_s20 }
 0x9af   :  { %v1978_v2 = vpop.permute.xlu0 %1977  ;;  %v1980_v7 = vpop.permute.xlu1 %1979 }
 0x9b0   :  { %v1981_v30 = vsel %vm971_vm1, %v1978_v2, %v1980_v7  ;;  %v1982_v31 = vsel %vm971_vm1, %v1980_v7, %v1978_v2 }
 0x9b1   :  { %v1983_v38 = vadd.f32 %v1982_v31, %v1975_v4  ;;  %v1984_v34 = vadd.f32 %v1981_v30, %v1976_v29 }
 0x9b3   :  { %v1985_v35 = vadd.f32 %v1984_v34, %v1983_v38 }
 0x9b5   :  { %v3623_v36 = vmul.f32 0.0009765625, %v1985_v35 }
 0x9b7   :  { %v1990_v37 = vrot.slane %v3623_v36, %v3190_v55 }
 0x9b9   :  { %v1992_v39 = vsub.f32 %v3585_v13, %v1990_v37  ;;  %v1994_v40 = vsub.f32 %v3589_v48, %v1990_v37  ;;  %v1991_v41 = vsub.f32 %v3581_v19, %v1990_v37  ;;  %v1993_v42 = vsub.f32 %v3583_v56, %v1990_v37 }
 0x9bb   :  { %v1996_v44 = vmul.f32 %v1992_v39, %v1992_v39  ;;  %v1998_v45 = vmul.f32 %v1994_v40, %v1994_v40  ;;  %v1995_v9 = vmul.f32 %v1991_v41, %v1991_v41  ;;  %v1997_v15 = vmul.f32 %v1993_v42, %v1993_v42  ;;  %v2055_v42 = vld [vmem:[%s3710_s5] sm:$0x3] }
 0x9bd   :  { %v2006_v46 = vadd.f32 %v1998_v45, %v1996_v44  ;;  %v1999_v17 = vadd.f32 %v1997_v15, %v1995_v9 }
 0x9bf   :  { %v2007_v49 = vrot.slane %v2006_v46, 4  ;;  %v2000_v50 = vrot.slane %v1999_v17, 4 }
 0x9c1   :  { %v2008_v32 = vadd.f32 %v2007_v49, %v2006_v46  ;;  %v2001_v33 = vadd.f32 %v2000_v50, %v1999_v17  ;;  %v2076_v50 = vld [vmem:[%s3711_s6] sm:$0x3] }
 0x9c3   :  { %v2009_v51 = vrot.slane %v2008_v32, 2  ;;  %v2002_v53 = vrot.slane %v2001_v33, 2 }
 0x9c5   :  { %v2010_v54 = vadd.f32 %v2009_v51, %v2008_v32  ;;  %v2003_v57 = vadd.f32 %v2002_v53, %v2001_v33 }
 0x9c7   :  { %v2011_v59 = vrot.slane %v2010_v54, 1  ;;  %v2004_v61 = vrot.slane %v2003_v57, 1 }
 0x9c9   :  { %v2012_v58 = vadd.f32 %v2011_v59, %v2010_v54  ;;  %v2005_v60 = vadd.f32 %v2004_v61, %v2003_v57 }
 0x9cb   :  { %2015 = vrot.lane.b32.xlu1 %v2012_v58, %s2666_s1  ;;  %2013 = vrot.lane.b32.xlu0 %v2005_v60, %s2666_s1 }
 0xa3d   :  { %v2016_v62 = vpop.permute.xlu1 %2015  ;;  %v2014_v63 = vpop.permute.xlu0 %2013 }
 0xa3e   :  { %v2017_v3 = vsel %vm935_vm14, %v2014_v63, %v2016_v62  ;;  %v2018_v5 = vsel %vm935_vm14, %v2016_v62, %v2014_v63 }
 0xa3f   :  { %v2019_v6 = vadd.f32 %v2018_v5, %v2005_v60  ;;  %v2020_v43 = vadd.f32 %v2017_v3, %v2012_v58 }
 0xa41   :  { %2021 = vrot.lane.b32.xlu0 %v2019_v6, %s2667_s17  ;;  %2023 = vrot.lane.b32.xlu1 %v2020_v43, %s2667_s17 }
 0xab3   :  { %v2022_v8 = vpop.permute.xlu0 %2021  ;;  %v2024_v10 = vpop.permute.xlu1 %2023 }
 0xab4   :  { %v2025_v11 = vsel %vm944_vm2, %v2022_v8, %v2024_v10  ;;  %v2026_v12 = vsel %vm944_vm2, %v2024_v10, %v2022_v8 }
 0xab5   :  { %v2027_v0 = vadd.f32 %v2026_v12, %v2019_v6  ;;  %v2028_v14 = vadd.f32 %v2025_v11, %v2020_v43 }
 0xab7   :  { %2029 = vrot.lane.b32.xlu0 %v2027_v0, %s2668_s18  ;;  %2031 = vrot.lane.b32.xlu1 %v2028_v14, %s2668_s18 }
 0xb29   :  { %v2030_v16 = vpop.permute.xlu0 %2029  ;;  %v2032_v18 = vpop.permute.xlu1 %2031 }
 0xb2a   :  { %v2033_v20 = vsel %vm953_vm12, %v2030_v16, %v2032_v18  ;;  %v2034_v21 = vsel %vm953_vm12, %v2032_v18, %v2030_v16 }
 0xb2b   :  { %v2035_v22 = vadd.f32 %v2034_v21, %v2027_v0  ;;  %v2036_v23 = vadd.f32 %v2033_v20, %v2028_v14 }
 0xb2d   :  { %2037 = vrot.lane.b32.xlu0 %v2035_v22, %s2669_s19  ;;  %2039 = vrot.lane.b32.xlu1 %v2036_v23, %s2669_s19 }
 0xb9f   :  { %v2038_v24 = vpop.permute.xlu0 %2037  ;;  %v2040_v25 = vpop.permute.xlu1 %2039 }
 0xba0   :  { %v2041_v27 = vsel %vm962_vm8, %v2038_v24, %v2040_v25  ;;  %v2042_v1 = vsel %vm962_vm8, %v2040_v25, %v2038_v24 }
 0xba1   :  { %v2043_v28 = vadd.f32 %v2042_v1, %v2035_v22  ;;  %v2044_v4 = vadd.f32 %v2041_v27, %v2036_v23 }
 0xba3   :  { %2045 = vrot.lane.b32.xlu0 %v2043_v28, %s2670_s20  ;;  %2047 = vrot.lane.b32.xlu1 %v2044_v4, %s2670_s20 }
 0xc15   :  { %v2046_v29 = vpop.permute.xlu0 %2045  ;;  %v2048_v2 = vpop.permute.xlu1 %2047 }
 0xc16   :  { %v2049_v7 = vsel %vm971_vm1, %v2046_v29, %v2048_v2  ;;  %v2050_v30 = vsel %vm971_vm1, %v2048_v2, %v2046_v29 }
 0xc17   :  { %v2051_v31 = vadd.f32 %v2050_v30, %v2043_v28  ;;  %v2052_v38 = vadd.f32 %v2049_v7, %v2044_v4 }
 0xc19   :  { %v2053_v34 = vadd.f32 %v2052_v38, %v2051_v31 }
 0xc1b   :  { %v2054_v35 = vmul.f32 0.0009765625, %v2053_v34 }
 0xc1d   :  { %v2056_v37 = vadd.f32 1e-05, %v2054_v35 }
 0xc1f   :  { %2659 = vrsqrt.f32 %v2056_v37 }
 0xc2c   :  { %v2660_v39 = vpop.eup %2659 }
 0xc2d   :  { %v2059_v40 = vcombine.low %v2660_v39, %v2660_v39 }
 0xc2f   :  { %v2066_v41 = vrot.slane %v2059_v40, %v3434_v47 }
 0xc31   :  { %v2073_v44 = vrot.slane %v2066_v41, %v3434_v47 }
 0xc33   :  { %v2075_v45 = vmul.f32 %v2073_v44, %v2055_v42 }
 0xc35   :  { %v2081_v26 = vrot.slane %v2075_v45, %v3190_v55  ;;  %v2085_v9 = vrot.slane %v2075_v45, %v3442_v52 }
 0xc37   :  { %v2088_v15 = vmul.f32 %v2081_v26, %v3623_v36  ;;  %v2089_v46 = vmul.f32 %v2085_v9, %v3623_v36  ;;  %v2109_v51 = vmul.f32 %v2081_v26, %v3581_v19  ;;  %v2110_v53 = vmul.f32 %v2085_v9, %v3585_v13  ;;  %v2662_v19 = vld [vmem:[%s3706_s0 + $0x8] sm:$0xff] }
 0xc38   :  { %v2111_v54 = vmul.f32 %v2081_v26, %v3583_v56  ;;  %v2112_v57 = vmul.f32 %v2085_v9, %v3589_v48 }
 0xc39   :  { %v2092_v17 = vcombine.low %v2088_v15, %v2089_v46 }
 0xc3b   :  { %v2099_v49 = vrot.slane %v2092_v17, %v3434_v47 }
 0xc3d   :  { %v2106_v32 = vrot.slane %v2099_v49, %v3434_v47  ;;  %v2661_v47 = vld [vmem:[%s3706_s0] sm:$0xff] }
 0xc3f   :  { %v2108_v33 = vsub.f32 %v2076_v50, %v2106_v32 }
 0xc41   :  { %v2117_v36 = vrot.slane %v2108_v33, %v3190_v55  ;;  %v2121_v59 = vrot.slane %v2108_v33, %v3442_v52  ;;  %v2663_v55 = vld [vmem:[%s3706_s0 + $0x10] sm:$0xff]  ;;  %v2664_v52 = vld [vmem:[%s3706_s0 + $0x18] sm:$0xff] }
 0xc43   :  { %v2124_v61 = vadd.f32 %v2117_v36, %v2109_v51  ;;  %v2125_v58 = vadd.f32 %v2121_v59, %v2110_v53  ;;  %v2126_v60 = vadd.f32 %v2117_v36, %v2111_v54  ;;  %v2127_v62 = vadd.f32 %v2121_v59, %v2112_v57 }
 0xc45   :  { %v2128_v63 = vadd.f32 %v2661_v47, %v2124_v61  ;;  %v2129_v56 = vadd.f32 %v2662_v19, %v2125_v58  ;;  %v2130_v13 = vadd.f32 %v2663_v55, %v2126_v60  ;;  %v2131_v48 = vadd.f32 %v2664_v52, %v2127_v62 }
 0xc47   :  { %v2132_v3 = vmax.f32 %v2128_v63, 0.0  ;;  %v2133_v5 = vmax.f32 %v2129_v56, 0.0  ;;  %v2134_v6 = vmax.f32 %v2130_v13, 0.0  ;;  %v2135_v43 = vmax.f32 %v2131_v48, 0.0 }
 0xc49   :  { %2136 = vst [vmem:[%s3712_s7] sm:$0xff] %v2132_v3  ;;  %2137 = vst [vmem:[%s3712_s7 + $0x8] sm:$0xff] %v2133_v5 }
 0xc4a   :  { %2138 = vst [vmem:[%s3712_s7 + $0x10] sm:$0xff] %v2134_v6  ;;  %2139 = vst [vmem:[%s3712_s7 + $0x18] sm:$0xff] %v2135_v43 }

</bundles_post_ra>
